<compile_context>
chip_gen: v7x
topology: tpu7x:2x2x1
jax: 0.10.0
libtpu: 0.0.40
codegen_flags: <defaults>
</compile_context>

<pallas_src>
import math

import jax
import jax.numpy as jnp
from jax.experimental import pallas as pl
from jax.experimental.pallas import tpu as pltpu

# Safe scoped-VMEM request on all generations (v5e default 16 MiB, v6e/v7x 32 MiB,
# v7x physical 64 MiB). Our worst-case working set with 512-tiles is well below this.
_VMEM_LIMIT = 32 * 1024 * 1024


def _round_up(x, m):
    return ((x + m - 1) // m) * m


# ---------------------------------------------------------------------------
# Pass 0: fts_cat = concat(pos @ W, neg @ W, axis=1), stored in bf16 for pass 1.
# ---------------------------------------------------------------------------
def _fts_kernel(pos_ref, neg_ref, w_ref, out_ref):
    w = w_ref[...]                                   # (F, H) f32, resident
    h = w_ref.shape[1]
    fp = jnp.dot(pos_ref[...], w, preferred_element_type=jnp.float32)
    fn = jnp.dot(neg_ref[...], w, preferred_element_type=jnp.float32)
    out_ref[:, 0:h] = fp.astype(out_ref.dtype)
    out_ref[:, h:2 * h] = fn.astype(out_ref.dtype)


# ---------------------------------------------------------------------------
# Pass 1: h_cat = PReLU(adj @ fts_cat + b_cat), tiled (row i, reduction k) grid.
# ---------------------------------------------------------------------------
def _adj_gcn_kernel(adj_ref, fts_ref, bcat_ref, a_ref, hcat_ref, acc_ref):
    k = pl.program_id(1)
    nk = pl.num_programs(1)
    tk = adj_ref.shape[1]

    @pl.when(k == 0)
    def _init():
        acc_ref[...] = jnp.zeros_like(acc_ref)

    # fts_cat is fully resident in VMEM; slice the k-th reduction tile.
    off = pl.multiple_of(k * tk, tk)
    fts_k = fts_ref[pl.ds(off, tk), :]               # (TK, 2H) bf16
    acc_ref[...] += jnp.dot(adj_ref[...], fts_k,
                            preferred_element_type=jnp.float32)

    @pl.when(k == nk - 1)
    def _finalize():
        a = a_ref[0]                                 # PReLU slope (SMEM scalar)
        out = acc_ref[...] + bcat_ref[...]
        hcat_ref[...] = jnp.where(out > 0, out, a * out)


# ---------------------------------------------------------------------------
# Pass 2: readout + bilinear discriminator epilogue.
#   s = sigmoid(mean_n h[n,:]); v = W_b @ s; D = h @ v + bb (and same for h~).
# The column-sum of h is recomputed here from h_cat (only N*2H bytes) instead of
# being carried as a cross-grid accumulator in pass 1 — this keeps pass 1's row
# axis safely megacore-parallel.
# ---------------------------------------------------------------------------
def _disc_kernel(hcat_ref, wbt_ref, bb_ref, n_ref, out_ref):
    h_dim = wbt_ref.shape[0]
    hcat = hcat_ref[...]                             # (N_pad, 2H) f32
    h = hcat[:, 0:h_dim]
    ht = hcat[:, h_dim:2 * h_dim]

    n_true = n_ref[0]
    rows = jax.lax.broadcasted_iota(jnp.int32, h.shape, 0)
    mask = (rows < n_true).astype(jnp.float32)       # exclude padded rows
    s = jax.nn.sigmoid(jnp.sum(h * mask, axis=0, keepdims=True)
                       / n_true.astype(jnp.float32))                  # (1, H)
    v = jnp.dot(s, wbt_ref[...], preferred_element_type=jnp.float32)  # (1, H)
    bb = bb_ref[0]
    out_ref[:, 0:1] = jnp.sum(h * v, axis=1, keepdims=True) + bb      # D_pos
    out_ref[:, 1:2] = jnp.sum(ht * v, axis=1, keepdims=True) + bb     # D_neg


@jax.jit
def dgi_forward(pos, neg, adj, params):
    """pos, neg: (1, N, F) f32; adj: (N, N) f32 (dense). Returns (1, 2N) f32."""
    n = adj.shape[0]
    f = pos.shape[-1]
    h = params["w_gcn"].shape[0]
    h2 = 2 * h

    # Tile size: big enough to amortize per-step overhead, small enough for the
    # v7x 64-MiB VMEM budget (adj tile bf16 at 512x512 = 512 KiB, x2 buffers).
    tile = min(512, _round_up(n, 128))
    n_pad = _round_up(n, tile)
    pad = n_pad - n
    grid_rows = n_pad // tile

    # Zero-pad nodes to the tile multiple (padded rows excluded from the readout
    # mean inside the epilogue and sliced off the final output).
    x_pos = jnp.pad(pos[0], ((0, pad), (0, 0)))
    x_neg = jnp.pad(neg[0], ((0, pad), (0, 0)))
    adj_bf16 = jnp.pad(adj, ((0, pad), (0, pad))).astype(jnp.bfloat16)

    w_t = params["w_gcn"].T.astype(jnp.float32)                       # (F, H)
    b_cat = jnp.concatenate([params["b_gcn"], params["b_gcn"]]
                            )[None, :].astype(jnp.float32)            # (1, 2H)
    a = jnp.asarray(params["prelu_a"], jnp.float32).reshape(1)        # SMEM scalar
    wb_t = params["w_bil"][0].T.astype(jnp.float32)                   # (H, H)
    bb = jnp.asarray(params["b_bil"], jnp.float32).reshape(1)         # SMEM scalar
    n_true = jnp.full((1,), n, jnp.int32)                             # SMEM scalar

    # ---- pass 0: fts_cat = [pos @ W | neg @ W]  (bf16) --------------------
    fts_cat = pl.pallas_call(
        _fts_kernel,
        out_shape=jax.ShapeDtypeStruct((n_pad, h2), jnp.bfloat16),
        grid=(grid_rows,),
        in_specs=[
            pl.BlockSpec((tile, f), lambda i: (i, 0)),
            pl.BlockSpec((tile, f), lambda i: (i, 0)),
            pl.BlockSpec((f, h), lambda i: (0, 0)),
        ],
        out_specs=pl.BlockSpec((tile, h2), lambda i: (i, 0)),
        compiler_params=pltpu.CompilerParams(
            dimension_semantics=("parallel",),
            vmem_limit_bytes=_VMEM_LIMIT),
    )(x_pos, x_neg, w_t)

    # ---- pass 1: h_cat = PReLU(adj @ fts_cat + b) (fused pos/neg GCN) -----
    cost = pl.CostEstimate(
        flops=2 * n_pad * n_pad * h2,
        transcendentals=0,
        bytes_accessed=n_pad * n_pad * 2 + n_pad * h2 * 2 + n_pad * h2 * 4)
    h_cat = pl.pallas_call(
        _adj_gcn_kernel,
        out_shape=jax.ShapeDtypeStruct((n_pad, h2), jnp.float32),
        grid=(grid_rows, grid_rows),
        in_specs=[
            pl.BlockSpec((tile, tile), lambda i, k: (i, k)),        # adj tile (streams)
            pl.BlockSpec((n_pad, h2), lambda i, k: (0, 0)),         # fts_cat resident
            pl.BlockSpec((1, h2), lambda i, k: (0, 0)),             # GCN bias (cat'd)
            pl.BlockSpec(memory_space=pltpu.MemorySpace.SMEM),      # PReLU slope
        ],
        out_specs=pl.BlockSpec((tile, h2), lambda i, k: (i, 0)),
        scratch_shapes=[pltpu.VMEM((tile, h2), jnp.float32)],       # f32 accumulator
        compiler_params=pltpu.CompilerParams(
            dimension_semantics=("parallel", "arbitrary"),
            vmem_limit_bytes=_VMEM_LIMIT),
        cost_estimate=cost,
    )(adj_bf16, fts_cat, b_cat, a)

    # ---- pass 2: readout + bilinear discriminator epilogue ----------------
    d = pl.pallas_call(
        _disc_kernel,
        out_shape=jax.ShapeDtypeStruct((n_pad, 2), jnp.float32),
        in_specs=[
            pl.BlockSpec(memory_space=pltpu.MemorySpace.VMEM),      # h_cat
            pl.BlockSpec(memory_space=pltpu.MemorySpace.VMEM),      # W_b^T
            pl.BlockSpec(memory_space=pltpu.MemorySpace.SMEM),      # bilinear bias
            pl.BlockSpec(memory_space=pltpu.MemorySpace.SMEM),      # true node count
        ],
        out_specs=pl.BlockSpec(memory_space=pltpu.MemorySpace.VMEM),
        compiler_params=pltpu.CompilerParams(vmem_limit_bytes=_VMEM_LIMIT),
    )(h_cat, wb_t, bb, n_true)

    # (N, 2): col 0 = D_pos, col 1 = D_neg  ->  (1, 2N) = [D_pos..., D_neg...]
    d = d[:n, :]
    return jnp.transpose(d).reshape(1, 2 * n)


def init_params(key, in_features, n_h):
    k1, k2 = jax.random.split(key, 2)
    # GCN linear weight: xavier_uniform on (n_h, in_features), no linear bias.
    bound_g = math.sqrt(6.0 / (in_features + n_h))
    w_gcn = jax.random.uniform(k1, (n_h, in_features), jnp.float32, -bound_g, bound_g)
    b_gcn = jnp.zeros((n_h,), jnp.float32)           # GCN.bias, filled with 0
    # Bilinear weight: xavier_uniform on (1, n_h, n_h).
    bound_b = math.sqrt(6.0 / (n_h * n_h + n_h))
    w_bil = jax.random.uniform(k2, (1, n_h, n_h), jnp.float32, -bound_b, bound_b)
    b_bil = jnp.zeros((1,), jnp.float32)
    return {
        "w_gcn": w_gcn,
        "b_gcn": b_gcn,
        "prelu_a": jnp.array(0.25, jnp.float32),     # nn.PReLU default init
        "w_bil": w_bil,
        "b_bil": b_bil,
    }


if __name__ == "__main__":
    N = 8              # number of graph nodes
    in_features = 16
    n_h = 32

    key = jax.random.PRNGKey(0)
    kp, kn, ka, kw = jax.random.split(key, 4)

    pos = jax.random.normal(kp, (1, N, in_features), jnp.float32)
    neg = jax.random.normal(kn, (1, N, in_features), jnp.float32)
    # dense (row-normalized) adjacency standing in for the sparse adj_mat
    adj_raw = jax.random.uniform(ka, (N, N), jnp.float32)
    adj = adj_raw / jnp.sum(adj_raw, axis=1, keepdims=True)

    params = init_params(kw, in_features, n_h)

    res = dgi_forward(pos, neg, adj, params)
    jax.block_until_ready(res)
    assert res.shape == (1, 2 * N), res.shape
    assert bool(jnp.all(jnp.isfinite(res)))
    print("KERNEL_OK")
</pallas_src>

<mosaic_0001>
module attributes {stable_mosaic.version = 11 : i64} {
  func.func @_fts_kernel(%arg0: i32, %arg1: memref<128x16xf32, #tpu.memory_space<vmem>>, %arg2: memref<128x16xf32, #tpu.memory_space<vmem>>, %arg3: memref<16x32xf32, #tpu.memory_space<vmem>>, %arg4: memref<128x64xbf16, #tpu.memory_space<vmem>>) attributes {dimension_semantics = [#tpu.dimension_semantics<parallel>], iteration_bounds = array<i64: 1>, scalar_prefetch = 0 : i64, scratch_operands = 0 : i64, tpu.core_type = #tpu.core_type<tc>, window_params = [{transform_indices = @transform_0, window_bounds = array<i64: 128, 16>}, {transform_indices = @transform_1, window_bounds = array<i64: 128, 16>}, {pipeline_mode = #tpu.pipeline_mode<synchronous>, transform_indices = @transform_2, window_bounds = array<i64: 16, 32>}, {transform_indices = @transform_3, window_bounds = array<i64: 128, 64>}]} {
    %c0 = arith.constant 0 : index
    %c0_0 = arith.constant 0 : index
    %0 = vector.load %arg3[%c0, %c0_0] : memref<16x32xf32, #tpu.memory_space<vmem>>, vector<16x32xf32>
    %c0_1 = arith.constant 0 : index
    %c0_2 = arith.constant 0 : index
    %1 = vector.load %arg1[%c0_1, %c0_2] : memref<128x16xf32, #tpu.memory_space<vmem>>, vector<128x16xf32>
    %cst = arith.constant dense<0.000000e+00> : vector<128x32xf32>
    %2 = tpu.matmul %1, %0, %cst {dimension_numbers = #tpu.dot_dimension_numbers<[1], [0], [0], [1], [0, 0, 1, 1], [], []>} : vector<128x16xf32>, vector<16x32xf32>, vector<128x32xf32> -> vector<128x32xf32>
    %c0_3 = arith.constant 0 : index
    %c0_4 = arith.constant 0 : index
    %3 = vector.load %arg2[%c0_3, %c0_4] : memref<128x16xf32, #tpu.memory_space<vmem>>, vector<128x16xf32>
    %cst_5 = arith.constant dense<0.000000e+00> : vector<128x32xf32>
    %4 = tpu.matmul %3, %0, %cst_5 {dimension_numbers = #tpu.dot_dimension_numbers<[1], [0], [0], [1], [0, 0, 1, 1], [], []>} : vector<128x16xf32>, vector<16x32xf32>, vector<128x32xf32> -> vector<128x32xf32>
    %5 = arith.truncf %2 : vector<128x32xf32> to vector<128x32xbf16>
    %c0_6 = arith.constant 0 : index
    %c0_7 = arith.constant 0 : index
    %6 = vector.load %arg4[%c0_6, %c0_7] : memref<128x64xbf16, #tpu.memory_space<vmem>>, vector<128x32xbf16>
    tpu.vector_store %arg4[%c0_6, %c0_7], %5 {strides = array<i32>} : memref<128x64xbf16, #tpu.memory_space<vmem>>, vector<128x32xbf16>,
    %7 = arith.truncf %4 : vector<128x32xf32> to vector<128x32xbf16>
    %c0_8 = arith.constant 0 : index
    %c32 = arith.constant 32 : index
    %8 = vector.load %arg4[%c0_8, %c32] : memref<128x64xbf16, #tpu.memory_space<vmem>>, vector<128x32xbf16>
    tpu.vector_store %arg4[%c0_8, %c32], %7 {strides = array<i32>} : memref<128x64xbf16, #tpu.memory_space<vmem>>, vector<128x32xbf16>,
    return
  }
  func.func @transform_0(%arg0: i32) -> (i32, i32) {
    %c0_i32 = arith.constant 0 : i32
    %c0_i32_0 = arith.constant 0 : i32
    return %arg0, %c0_i32 : i32, i32
  }
  func.func @transform_1(%arg0: i32) -> (i32, i32) {
    %c0_i32 = arith.constant 0 : i32
    %c0_i32_0 = arith.constant 0 : i32
    return %arg0, %c0_i32 : i32, i32
  }
  func.func @transform_2(%arg0: i32) -> (i32, i32) {
    %c0_i32 = arith.constant 0 : i32
    %c0_i32_0 = arith.constant 0 : i32
    %c0_i32_1 = arith.constant 0 : i32
    return %c0_i32, %c0_i32_0 : i32, i32
  }
  func.func @transform_3(%arg0: i32) -> (i32, i32) {
    %c0_i32 = arith.constant 0 : i32
    %c0_i32_0 = arith.constant 0 : i32
    return %arg0, %c0_i32 : i32, i32
  }
}

module attributes {stable_mosaic.version = 11 : i64} {
  func.func @_adj_gcn_kernel(%arg0: i32, %arg1: i32, %arg2: memref<128x128xbf16, #tpu.memory_space<vmem>>, %arg3: memref<128x64xbf16, #tpu.memory_space<vmem>>, %arg4: memref<1x64xf32, #tpu.memory_space<vmem>>, %arg5: memref<1xf32, #tpu.memory_space<smem>>, %arg6: memref<128x64xf32, #tpu.memory_space<vmem>>, %arg7: memref<128x64xf32, #tpu.memory_space<vmem>>) attributes {dimension_semantics = [#tpu.dimension_semantics<parallel>, #tpu.dimension_semantics<arbitrary>], iteration_bounds = array<i64: 1, 1>, scalar_prefetch = 0 : i64, scratch_operands = 1 : i64, tpu.core_type = #tpu.core_type<tc>, window_params = [{transform_indices = @transform_0, window_bounds = array<i64: 128, 128>}, {pipeline_mode = #tpu.pipeline_mode<synchronous>, transform_indices = @transform_1, window_bounds = array<i64: 128, 64>}, {pipeline_mode = #tpu.pipeline_mode<synchronous>, transform_indices = @transform_2, window_bounds = array<i64: 1, 64>}, {transform_indices = @transform_3, window_bounds = array<i64: 1>}, {transform_indices = @transform_4, window_bounds = array<i64: 128, 64>}]} {
    %c0_i32 = arith.constant 0 : i32
    %0 = arith.cmpi eq, %arg1, %c0_i32 : i32
    %1 = arith.extui %0 : i1 to i32
    %c0_i32_0 = arith.constant 0 : i32
    %2 = arith.cmpi ne, %1, %c0_i32_0 : i32
    scf.if %2 {
      %cst_9 = arith.constant 0.000000e+00 : f32
      %15 = vector.broadcast %cst_9 : f32 to vector<128x64xf32>
      %c0_10 = arith.constant 0 : index
      %c0_11 = arith.constant 0 : index
      %16 = vector.load %arg7[%c0_10, %c0_11] : memref<128x64xf32, #tpu.memory_space<vmem>>, vector<128x64xf32>
      tpu.vector_store %arg7[%c0_10, %c0_11], %15 {strides = array<i32>} : memref<128x64xf32, #tpu.memory_space<vmem>>, vector<128x64xf32>,
    } else {
    }
    %c128_i32 = arith.constant 128 : i32
    %3 = arith.muli %arg1, %c128_i32 : i32
    %4 = tpu.assume_multiple %3, 128 : i32
    %5 = arith.index_cast %4 : i32 to index
    %c0 = arith.constant 0 : index
    %6 = vector.load %arg3[%5, %c0] : memref<128x64xbf16, #tpu.memory_space<vmem>>, vector<128x64xbf16>
    %c0_1 = arith.constant 0 : index
    %c0_2 = arith.constant 0 : index
    %7 = vector.load %arg7[%c0_1, %c0_2] : memref<128x64xf32, #tpu.memory_space<vmem>>, vector<128x64xf32>
    %c0_3 = arith.constant 0 : index
    %c0_4 = arith.constant 0 : index
    %8 = vector.load %arg2[%c0_3, %c0_4] : memref<128x128xbf16, #tpu.memory_space<vmem>>, vector<128x128xbf16>
    %cst = arith.constant dense<0.000000e+00> : vector<128x64xf32>
    %9 = tpu.matmul %8, %6, %cst {dimension_numbers = #tpu.dot_dimension_numbers<[1], [0], [0], [1], [0, 0, 1, 1], [], []>} : vector<128x128xbf16>, vector<128x64xbf16>, vector<128x64xf32> -> vector<128x64xf32>
    %10 = arith.addf %7, %9 : vector<128x64xf32>
    %c0_5 = arith.constant 0 : index
    %c0_6 = arith.constant 0 : index
    %11 = vector.load %arg7[%c0_5, %c0_6] : memref<128x64xf32, #tpu.memory_space<vmem>>, vector<128x64xf32>
    tpu.vector_store %arg7[%c0_5, %c0_6], %10 {strides = array<i32>} : memref<128x64xf32, #tpu.memory_space<vmem>>, vector<128x64xf32>,
    %c0_i32_7 = arith.constant 0 : i32
    %12 = arith.cmpi eq, %arg1, %c0_i32_7 : i32
    %13 = arith.extui %12 : i1 to i32
    %c0_i32_8 = arith.constant 0 : i32
    %14 = arith.cmpi ne, %13, %c0_i32_8 : i32
    scf.if %14 {
      %c0_9 = arith.constant 0 : index
      %15 = memref.load %arg5[%c0_9] : memref<1xf32, #tpu.memory_space<smem>>
      %c0_10 = arith.constant 0 : index
      %c0_11 = arith.constant 0 : index
      %16 = vector.load %arg7[%c0_10, %c0_11] : memref<128x64xf32, #tpu.memory_space<vmem>>, vector<128x64xf32>
      %c0_12 = arith.constant 0 : index
      %c0_13 = arith.constant 0 : index
      %17 = vector.load %arg4[%c0_12, %c0_13] : memref<1x64xf32, #tpu.memory_space<vmem>>, vector<1x64xf32>
      %18 = vector.broadcast %17 : vector<1x64xf32> to vector<128x64xf32>
      %19 = arith.addf %16, %18 : vector<128x64xf32>
      %cst_14 = arith.constant 0.000000e+00 : f32
      %20 = vector.broadcast %cst_14 : f32 to vector<128x64xf32>
      %21 = arith.cmpf ogt, %19, %20 : vector<128x64xf32>
      %22 = vector.broadcast %15 : f32 to vector<128x64xf32>
      %23 = arith.mulf %22, %19 : vector<128x64xf32>
      %24 = arith.select %21, %19, %23 : vector<128x64xi1>, vector<128x64xf32>
      %c0_15 = arith.constant 0 : index
      %c0_16 = arith.constant 0 : index
      %25 = vector.load %arg6[%c0_15, %c0_16] : memref<128x64xf32, #tpu.memory_space<vmem>>, vector<128x64xf32>
      tpu.vector_store %arg6[%c0_15, %c0_16], %24 {strides = array<i32>} : memref<128x64xf32, #tpu.memory_space<vmem>>, vector<128x64xf32>,
    } else {
    }
    return
  }
  func.func @transform_0(%arg0: i32, %arg1: i32) -> (i32, i32) {
    %c0_i32 = arith.constant 0 : i32
    return %arg0, %arg1 : i32, i32
  }
  func.func @transform_1(%arg0: i32, %arg1: i32) -> (i32, i32) {
    %c0_i32 = arith.constant 0 : i32
    %c0_i32_0 = arith.constant 0 : i32
    %c0_i32_1 = arith.constant 0 : i32
    return %c0_i32, %c0_i32_0 : i32, i32
  }
  func.func @transform_2(%arg0: i32, %arg1: i32) -> (i32, i32) {
    %c0_i32 = arith.constant 0 : i32
    %c0_i32_0 = arith.constant 0 : i32
    %c0_i32_1 = arith.constant 0 : i32
    return %c0_i32, %c0_i32_0 : i32, i32
  }
  func.func @transform_3(%arg0: i32, %arg1: i32) -> i32 {
    %c0_i32 = arith.constant 0 : i32
    %c0_i32_0 = arith.constant 0 : i32
    return %c0_i32 : i32
  }
  func.func @transform_4(%arg0: i32, %arg1: i32) -> (i32, i32) {
    %c0_i32 = arith.constant 0 : i32
    %c0_i32_0 = arith.constant 0 : i32
    return %arg0, %c0_i32 : i32, i32
  }
}

module attributes {stable_mosaic.version = 11 : i64} {
  func.func @_disc_kernel(%arg0: memref<128x64xf32, #tpu.memory_space<vmem>>, %arg1: memref<32x32xf32, #tpu.memory_space<vmem>>, %arg2: memref<1xf32, #tpu.memory_space<smem>>, %arg3: memref<1xi32, #tpu.memory_space<smem>>, %arg4: memref<128x2xf32, #tpu.memory_space<vmem>>) attributes {dimension_semantics = [], scalar_prefetch = 0 : i64, scratch_operands = 0 : i64, tpu.core_type = #tpu.core_type<tc>} {
    %c0 = arith.constant 0 : index
    %c0_0 = arith.constant 0 : index
    %0 = vector.load %arg0[%c0, %c0_0] : memref<128x64xf32, #tpu.memory_space<vmem>>, vector<128x64xf32>
    %1 = vector.extract_strided_slice %0 {offsets = [0, 0], sizes = [128, 32], strides = [1, 1]} : vector<128x64xf32> to vector<128x32xf32>
    %2 = vector.extract_strided_slice %0 {offsets = [0, 32], sizes = [128, 32], strides = [1, 1]} : vector<128x64xf32> to vector<128x32xf32>
    %c0_1 = arith.constant 0 : index
    %3 = memref.load %arg3[%c0_1] : memref<1xi32, #tpu.memory_space<smem>>
    %4 = tpu.iota {dimensions = array<i32: 0>} : vector<128x32xi32>
    %5 = vector.broadcast %3 : i32 to vector<128x32xi32>
    %6 = arith.cmpi slt, %4, %5 : vector<128x32xi32>
    %7 = arith.extui %6 : vector<128x32xi1> to vector<128x32xi32>
    %8 = arith.sitofp %7 : vector<128x32xi32> to vector<128x32xf32>
    %9 = arith.mulf %1, %8 : vector<128x32xf32>
    %cst = arith.constant dense<0.000000e+00> : vector<32xf32>
    %10 = vector.multi_reduction <add>, %9, %cst [0] : vector<128x32xf32> to vector<32xf32>
    %11 = vector.shape_cast %10 : vector<32xf32> to vector<1x32xf32>
    %12 = arith.sitofp %3 : i32 to f32
    %13 = vector.broadcast %12 : f32 to vector<1x32xf32>
    %14 = arith.divf %11, %13 : vector<1x32xf32>
    %15 = arith.negf %14 : vector<1x32xf32>
    %16 = math.exp %15 : vector<1x32xf32>
    %cst_2 = arith.constant 1.000000e+00 : f32
    %17 = vector.broadcast %cst_2 : f32 to vector<1x32xf32>
    %18 = arith.addf %17, %16 : vector<1x32xf32>
    %19 = arith.divf %17, %18 : vector<1x32xf32>
    %c0_3 = arith.constant 0 : index
    %c0_4 = arith.constant 0 : index
    %20 = vector.load %arg1[%c0_3, %c0_4] : memref<32x32xf32, #tpu.memory_space<vmem>>, vector<32x32xf32>
    %cst_5 = arith.constant dense<0.000000e+00> : vector<1x32xf32>
    %21 = tpu.matmul %19, %20, %cst_5 {dimension_numbers = #tpu.dot_dimension_numbers<[1], [0], [0], [1], [0, 0, 1, 1], [], []>} : vector<1x32xf32>, vector<32x32xf32>, vector<1x32xf32> -> vector<1x32xf32>
    %c0_6 = arith.constant 0 : index
    %22 = memref.load %arg2[%c0_6] : memref<1xf32, #tpu.memory_space<smem>>
    %23 = vector.broadcast %21 : vector<1x32xf32> to vector<128x32xf32>
    %24 = arith.mulf %1, %23 : vector<128x32xf32>
    %cst_7 = arith.constant dense<0.000000e+00> : vector<128xf32>
    %25 = vector.multi_reduction <add>, %24, %cst_7 [1] : vector<128x32xf32> to vector<128xf32>
    %26 = vector.shape_cast %25 : vector<128xf32> to vector<128x1xf32>
    %27 = vector.broadcast %22 : f32 to vector<128x1xf32>
    %28 = arith.addf %26, %27 : vector<128x1xf32>
    %c0_8 = arith.constant 0 : index
    %c0_9 = arith.constant 0 : index
    %29 = vector.load %arg4[%c0_8, %c0_9] : memref<128x2xf32, #tpu.memory_space<vmem>>, vector<128x1xf32>
    tpu.vector_store %arg4[%c0_8, %c0_9], %28 {strides = array<i32>} : memref<128x2xf32, #tpu.memory_space<vmem>>, vector<128x1xf32>,
    %30 = vector.broadcast %21 : vector<1x32xf32> to vector<128x32xf32>
    %31 = arith.mulf %2, %30 : vector<128x32xf32>
    %cst_10 = arith.constant dense<0.000000e+00> : vector<128xf32>
    %32 = vector.multi_reduction <add>, %31, %cst_10 [1] : vector<128x32xf32> to vector<128xf32>
    %33 = vector.shape_cast %32 : vector<128xf32> to vector<128x1xf32>
    %34 = vector.broadcast %22 : f32 to vector<128x1xf32>
    %35 = arith.addf %33, %34 : vector<128x1xf32>
    %c0_11 = arith.constant 0 : index
    %c1 = arith.constant 1 : index
    %36 = vector.load %arg4[%c0_11, %c1] : memref<128x2xf32, #tpu.memory_space<vmem>>, vector<128x1xf32>
    tpu.vector_store %arg4[%c0_11, %c1], %35 {strides = array<i32>} : memref<128x2xf32, #tpu.memory_space<vmem>>, vector<128x1xf32>,
    return
  }
}

</mosaic_0001>

<bundles_post_ra>
// kernel: dgi_forward.5
= control target key start
LH: loop header
LB: loop body
LE: loop exit
PB: predicated region body
PF: predicated region fallthrough
CT: control target
= control target key end

     0   :  { %v36_v0 = vlaneseq  ;;  %v566_v1 = vmov 0.0|0.0   ;;  %vm567_vm0 = vmmov 0   ;;  %v568_v5 = vmov 0.0   ;;  %s1045_s1 = inlined_call_operand.vmem [shape: f32[32,32], index: 1, kind: input, shape index: {}]   ;;  %s1046_s3 = inlined_call_operand.<no memory space> [shape: s32[1], index: 3, kind: input, shape index: {}]   ;;  %s1047_s0 = inlined_call_operand.vmem [shape: f32[128,64], index: 0, kind: input, shape index: {}]   ;;  %s1048_s2 = inlined_call_operand.<no memory space> [shape: f32[1], index: 2, kind: input, shape index: {}]   ;;  %s1049_s4 = inlined_call_operand.vmem [shape: f32[128,2], index: 4, kind: output, shape index: {}]  }
   0x1   :  { %549 = vmatprep.subr.bf16.mxu0 %v566_v1  ;;  %v166_v2 = vld [vmem:[%s1045_s1] sm:$0xff]  ;;  %v167_v3 = vld [vmem:[%s1045_s1 + $0x8] sm:$0xff]  ;;  %v168_v4 = vld [vmem:[%s1045_s1 + $0x10] sm:$0xff]  ;;  %546 = vmatprep.mubr.msk.f32.mxu0 %vm567_vm0, %v568_v5  ;;  %v616_v12 = vstv %s1046_s3  ;;  %vm118_vm7 = vcmask 261120   ;;  %s156_s5 = scvt.s32.f32 %s1046_s3  ;;  %s570_s3 = smov 96  }
   0x2   :  { %v550_v6 = vpack.c.bf16 %v167_v3, %v166_v2  ;;  %v169_v7 = vld [vmem:[%s1045_s1 + $0x18] sm:$0xff]  ;;  %v609_v8 = vshrl.u32 %v36_v0, 7  ;;  %v629_v16 = vld [vmem:[%s1047_s0] sm:$0xff]  ;;  %v634_v17 = vld [vmem:[%s1047_s0 + $0x8] sm:$0xff] }
   0x3   :  { %v553_v9 = vpack.c.bf16 %v169_v7, %v168_v4  ;;  %v639_v18 = vld [vmem:[%s1047_s0 + $0x10] sm:$0xff]  ;;  %v649_v23 = vld [vmem:[%s1047_s0 + $0x18] sm:$0xff]  ;;  %v660_v29 = vld [vmem:[%s1047_s0 + $0x20] sm:$0xff] }
   0x4   :  { %551 = vmatpush3.bf16.msra.mxu0 %v550_v6  ;;  %v38_v10 = vadd.s32 8, %v609_v8  ;;  %v39_v11 = vadd.s32 16, %v609_v8  ;;  %v40_v13 = vadd.s32 24, %v609_v8  ;;  %v41_v14 = vadd.s32 32, %v609_v8  ;;  %v669_v33 = vld [vmem:[%s1047_s0 + $0x28] sm:$0xff]  ;;  %v681_v40 = vld [vmem:[%s1047_s0 + $0x30] sm:$0xff] }
   0x5   :  { %552 = vmatprep.subr.bf16.mxu0 %v566_v1  ;;  %vm54_vm1 = vcmp.lt.s32.totalorder %v609_v8, %v616_v12  ;;  %v42_v15 = vadd.s32 40, %v609_v8  ;;  %v43_v22 = vadd.s32 48, %v609_v8  ;;  %v44_v24 = vadd.s32 56, %v609_v8  ;;  %v691_v46 = vld [vmem:[%s1047_s0 + $0x38] sm:$0xff]  ;;  %v701_v52 = vld [vmem:[%s1047_s0 + $0x40] sm:$0xff]  ;;  %v711_v58 = vld [vmem:[%s1047_s0 + $0x48] sm:$0xff] }
   0x6   :  { %vm55_vm2 = vcmp.lt.s32.totalorder %v38_v10, %v616_v12  ;;  %vm56_vm3 = vcmp.lt.s32.totalorder %v39_v11, %v616_v12  ;;  %vm57_vm4 = vcmp.lt.s32.totalorder %v40_v13, %v616_v12  ;;  %v515_v19 = vsel %vm54_vm1, 1.0, %v568_v5  ;;  %v721_v0 = vld [vmem:[%s1047_s0 + $0x50] sm:$0xff]  ;;  %v731_v7 = vld [vmem:[%s1047_s0 + $0x58] sm:$0xff] }
   0x7   :  { %v516_v20 = vsel %vm55_vm2, 1.0, %v568_v5  ;;  %v517_v21 = vsel %vm56_vm3, 1.0, %v568_v5  ;;  %vm58_vm5 = vcmp.lt.s32.totalorder %v41_v14, %v616_v12  ;;  %v518_v25 = vsel %vm57_vm4, 1.0, %v568_v5 }
   0x8   :  { %554 = vmatpush3.bf16.msra.mxu0 %v553_v9  ;;  %vm59_vm6 = vcmp.lt.s32.totalorder %v42_v15, %v616_v12  ;;  %v102_v26 = vmul.f32 %v515_v19, %v629_v16  ;;  %v103_v27 = vmul.f32 %v516_v20, %v634_v17  ;;  %v104_v28 = vmul.f32 %v517_v21, %v639_v18  ;;  %v741_v15 = vld [vmem:[%s1047_s0 + $0x60] sm:$0xff] }
   0x9   :  { %v519_v30 = vsel %vm58_vm5, 1.0, %v568_v5  ;;  %v45_v31 = vadd.s32 64, %v609_v8  ;;  %vm60_vm8 = vcmp.lt.s32.totalorder %v43_v22, %v616_v12  ;;  %v105_v32 = vmul.f32 %v518_v25, %v649_v23 }
   0xa   :  { %v46_v34 = vadd.s32 72, %v609_v8  ;;  %vm61_vm9 = vcmp.lt.s32.totalorder %v44_v24, %v616_v12  ;;  %v520_v35 = vsel %vm59_vm6, 1.0, %v568_v5  ;;  %v106_v36 = vmul.f32 %v519_v30, %v660_v29  ;;  %v750_v24 = vld [vmem:[%s1047_s0 + $0x68] sm:$0xff]  ;;  %v759_v30 = vld [vmem:[%s1047_s0 + $0x70] sm:$0xff] }
   0xb   :  { %v119_v37 = vsel %vm118_vm7, %v102_v26, 0.0  ;;  %v120_v38 = vsel %vm118_vm7, %v103_v27, 0.0  ;;  %v122_v39 = vsel %vm118_vm7, %v104_v28, 0.0  ;;  %v521_v41 = vsel %vm60_vm8, 1.0, %v568_v5 }
   0xc   :  { %v121_v42 = vadd.f32 %v120_v38, %v119_v37  ;;  %v47_v43 = vadd.s32 80, %v609_v8  ;;  %vm62_vm10 = vcmp.lt.s32.totalorder %v45_v31, %v616_v12  ;;  %v107_v44 = vmul.f32 %v520_v35, %v669_v33 }
   0xd   :  { %v124_v45 = vsel %vm118_vm7, %v105_v32, 0.0  ;;  %v522_v47 = vsel %vm61_vm9, 1.0, %v568_v5  ;;  %v48_v49 = vadd.s32 88, %v609_v8  ;;  %vm63_vm11 = vcmp.lt.s32.totalorder %v46_v34, %v616_v12 }
   0xe   :  { %v123_v48 = vadd.f32 %v122_v39, %v121_v42  ;;  %v108_v50 = vmul.f32 %v521_v41, %v681_v40  ;;  %v126_v51 = vsel %vm118_vm7, %v106_v36, 0.0  ;;  %v523_v53 = vsel %vm62_vm10, 1.0, %v568_v5 }
   0xf   :  { %v49_v55 = vadd.s32 96, %v609_v8  ;;  %vm64_vm12 = vcmp.lt.s32.totalorder %v47_v43, %v616_v12  ;;  %v109_v56 = vmul.f32 %v522_v47, %v691_v46  ;;  %v128_v57 = vsel %vm118_vm7, %v107_v44, 0.0 }
  0x10   :  { %v125_v54 = vadd.f32 %v124_v45, %v123_v48  ;;  %v524_v59 = vsel %vm63_vm11, 1.0, %v568_v5  ;;  %v50_v61 = vadd.s32 104, %v609_v8  ;;  %vm65_vm13 = vcmp.lt.s32.totalorder %v48_v49, %v616_v12 }
  0x11   :  { %v110_v62 = vmul.f32 %v523_v53, %v701_v52  ;;  %v130_v63 = vsel %vm118_vm7, %v108_v50, 0.0  ;;  %v525_v1 = vsel %vm64_vm12, 1.0, %v568_v5  ;;  %v51_v3 = vadd.s32 112, %v609_v8 }
  0x12   :  { %v127_v60 = vadd.f32 %v126_v51, %v125_v54  ;;  %vm66_vm14 = vcmp.lt.s32.totalorder %v49_v55, %v616_v12  ;;  %v111_v4 = vmul.f32 %v524_v59, %v711_v58  ;;  %v132_v6 = vsel %vm118_vm7, %v109_v56, 0.0 }
  0x13   :  { %v526_v9 = vsel %vm65_vm13, 1.0, %v568_v5  ;;  %v52_v11 = vadd.s32 120, %v609_v8  ;;  %vm67_vm15 = vcmp.lt.s32.totalorder %v50_v61, %v616_v12  ;;  %v112_v13 = vmul.f32 %v525_v1, %v721_v0 }
  0x14   :  { %v129_v2 = vadd.f32 %v128_v57, %v127_v60  ;;  %v134_v14 = vsel %vm118_vm7, %v110_v62, 0.0  ;;  %v527_v19 = vsel %vm66_vm14, 1.0, %v568_v5  ;;  %vm68_vm0 = vcmp.lt.s32.totalorder %v51_v3, %v616_v12 }
  0x15   :  { %v113_v21 = vmul.f32 %v526_v9, %v731_v7  ;;  %v136_v22 = vsel %vm118_vm7, %v111_v4, 0.0  ;;  %v528_v25 = vsel %vm67_vm15, 1.0, %v568_v5  ;;  %vm69_vm1 = vcmp.lt.s32.totalorder %v52_v11, %v616_v12  ;;  %v767_v12 = vld [vmem:[%s1047_s0 + $0x78] sm:$0xff]  ;;  %s569_s0 = smov 32  }
  0x16   :  { %v131_v10 = vadd.f32 %v130_v63, %v129_v2  ;;  %v114_v27 = vmul.f32 %v527_v19, %v741_v15  ;;  %v138_v28 = vsel %vm118_vm7, %v112_v13, 0.0  ;;  %v529_v31 = vsel %vm68_vm0, 1.0, %v568_v5 }
  0x17   :  { %v115_v34 = vmul.f32 %v528_v25, %v750_v24  ;;  %v140_v35 = vsel %vm118_vm7, %v113_v21, 0.0  ;;  %v530_v36 = vsel %vm69_vm1, 1.0, %v568_v5  ;;  %v116_v38 = vmul.f32 %v529_v31, %v759_v30 }
  0x18   :  { %v133_v20 = vadd.f32 %v132_v6, %v131_v10  ;;  %v142_v39 = vsel %vm118_vm7, %v114_v27, 0.0  ;;  %v117_v42 = vmul.f32 %v530_v36, %v767_v12  ;;  %v157_v49 = vstv %s156_s5 }
  0x19   :  { %v144_v43 = vsel %vm118_vm7, %v115_v34, 0.0  ;;  %v146_v45 = vsel %vm118_vm7, %v116_v38, 0.0  ;;  %560 = vrcp.f32 %v157_v49  ;;  %v246_v2 = vsub.s32 0, %v609_v8 }
  0x1a   :  { %v135_v26 = vadd.f32 %v134_v14, %v133_v20  ;;  %v148_v5 = vsel %vm118_vm7, %v117_v42, 0.0  ;;  %vm329_vm2 = vcmask 7168   ;;  %vm494_vm3 = vcmask 15368  }
  0x1c   :  { %v137_v32 = vadd.f32 %v136_v22, %v135_v26 }
  0x1e   :  { %v139_v37 = vadd.f32 %v138_v28, %v137_v32 }
  0x20   :  { %v141_v41 = vadd.f32 %v140_v35, %v139_v37 }
  0x22   :  { %v143_v44 = vadd.f32 %v142_v39, %v141_v41 }
  0x23   :  { %v561_v57 = vpop.eup %560 }
  0x24   :  { %v145_v47 = vadd.f32 %v144_v43, %v143_v44 }
  0x26   :  { %v147_v48 = vadd.f32 %v146_v45, %v145_v47 }
  0x28   :  { %v149_v50 = vadd.f32 %v148_v5, %v147_v48 }
  0x2a   :  { %v150_v51 = vrot.slane %v149_v50, 4 }
  0x2c   :  { %v151_v53 = vadd.f32 %v150_v51, %v149_v50 }
  0x2e   :  { %v152_v54 = vrot.slane %v151_v53, 2 }
  0x30   :  { %v153_v55 = vadd.f32 %v152_v54, %v151_v53 }
  0x32   :  { %v154_v56 = vrot.slane %v153_v55, 1 }
  0x34   :  { %v155_v59 = vadd.f32 %v154_v56, %v153_v55 }
  0x36   :  { %v159_v60 = vmul.f32 %v561_v57, %v155_v59 }
  0x38   :  { %v531_v61 = vmul.f32 -1.442695, %v159_v60 }
  0x3a   :  { %562 = vpow2.f32 %v531_v61 }
  0x44   :  { %v563_v62 = vpop.eup %562 }
  0x45   :  { %v163_v63 = vadd.f32 1.0, %v563_v62 }
  0x47   :  { %564 = vrcp.f32 %v163_v63 }
  0x51   :  { %v565_v1 = vpop.eup %564 }
  0x52   :  { %547 = vmatmul.mubr.msk.f32.vlgmr.msra.gmra.mrb[0].mxu0 %vm118_vm7, %v565_v1 }
 0x125   :  { %v239_v3 = vpop.f32.mrb[0].mxu0 }
 0x126   :  { %v781_v4 = vrot.slane %v239_v3, %v246_v2  ;;  %v548_v6 = vpop.f32.mrb[1].mxu0 }
 0x128   :  { %347 = vrot.lane.b32.xlu0 %v781_v4, %s569_s0  ;;  %v248_v9 = vmul.f32 %v781_v4, %v629_v16  ;;  %v251_v11 = vmul.f32 %v781_v4, %v649_v23  ;;  %v253_v8 = vmul.f32 %v781_v4, %v669_v33  ;;  %v255_v19 = vmul.f32 %v781_v4, %v691_v46 }
 0x129   :  { %v249_v21 = vmul.f32 %v781_v4, %v634_v17  ;;  %v250_v25 = vmul.f32 %v781_v4, %v639_v18  ;;  %v252_v27 = vmul.f32 %v781_v4, %v660_v29  ;;  %v254_v31 = vmul.f32 %v781_v4, %v681_v40 }
 0x12a   :  { %v264_v10 = vsel %vm118_vm7, %v248_v9, 0.0  ;;  %v273_v13 = vsel %vm118_vm7, %v251_v11, 0.0  ;;  %v279_v14 = vsel %vm118_vm7, %v253_v8, 0.0  ;;  %v285_v20 = vsel %vm118_vm7, %v255_v19, 0.0 }
 0x12b   :  { %265 = vadd.xlane.f32.xlu1 %v264_v10  ;;  %v267_v22 = vsel %vm118_vm7, %v249_v21, 0.0  ;;  %v270_v26 = vsel %vm118_vm7, %v250_v25, 0.0  ;;  %v276_v28 = vsel %vm118_vm7, %v252_v27, 0.0  ;;  %v282_v32 = vsel %vm118_vm7, %v254_v31, 0.0 }
 0x12c   :  { %v256_v34 = vmul.f32 %v781_v4, %v701_v52  ;;  %v258_v55 = vmul.f32 %v781_v4, %v721_v0  ;;  %v260_v60 = vmul.f32 %v781_v4, %v741_v15  ;;  %v257_v62 = vmul.f32 %v781_v4, %v711_v58 }
 0x12d   :  { %v262_v1 = vmul.f32 %v781_v4, %v759_v30  ;;  %v259_v3 = vmul.f32 %v781_v4, %v731_v7  ;;  %v261_v10 = vmul.f32 %v781_v4, %v750_v24  ;;  %v263_v8 = vmul.f32 %v781_v4, %v767_v12 }
 0x12e   :  { %v288_v35 = vsel %vm118_vm7, %v256_v34, 0.0  ;;  %v294_v59 = vsel %vm118_vm7, %v258_v55, 0.0  ;;  %v300_v63 = vsel %vm118_vm7, %v260_v60, 0.0 }
 0x12f   :  { %274 = vadd.xlane.f32.xlu1 %v273_v13  ;;  %v306_v6 = vsel %vm118_vm7, %v262_v1, 0.0  ;;  %v303_v13 = vsel %vm118_vm7, %v261_v10, 0.0 }
 0x133   :  { %280 = vadd.xlane.f32.xlu1 %v279_v14 }
 0x137   :  { %286 = vadd.xlane.f32.xlu1 %v285_v20 }
 0x147   :  { %268 = vadd.xlane.f32.xlu0 %v267_v22 }
 0x14b   :  { %271 = vadd.xlane.f32.xlu0 %v270_v26 }
 0x14f   :  { %277 = vadd.xlane.f32.xlu0 %v276_v28 }
 0x153   :  { %283 = vadd.xlane.f32.xlu0 %v282_v32 }
 0x157   :  { %289 = vadd.xlane.f32.xlu0 %v288_v35 }
 0x19a   :  { %v348_v36 = vpop.permute.xlu0 %347 }
 0x19b   :  { %v350_v37 = vmul.f32 %v348_v36, %v629_v16  ;;  %v351_v38 = vmul.f32 %v348_v36, %v634_v17  ;;  %v353_v39 = vmul.f32 %v348_v36, %v649_v23  ;;  %v352_v41 = vmul.f32 %v348_v36, %v639_v18 }
 0x19c   :  { %v355_v42 = vmul.f32 %v348_v36, %v669_v33  ;;  %v354_v43 = vmul.f32 %v348_v36, %v660_v29  ;;  %v357_v16 = vmul.f32 %v348_v36, %v691_v46  ;;  %v356_v17 = vmul.f32 %v348_v36, %v681_v40 }
 0x19d   :  { %382 = vrot.lane.b32.xlu0 %v350_v37, %s570_s3  ;;  %384 = vrot.lane.b32.xlu1 %v351_v38, %s570_s3  ;;  %v359_v18 = vmul.f32 %v348_v36, %v711_v58  ;;  %v358_v23 = vmul.f32 %v348_v36, %v701_v52  ;;  %v361_v29 = vmul.f32 %v348_v36, %v731_v7  ;;  %v842_v52 = vstv %s1048_s2 }
 0x19e   :  { %v360_v33 = vmul.f32 %v348_v36, %v721_v0  ;;  %v363_v40 = vmul.f32 %v348_v36, %v750_v24  ;;  %v362_v46 = vmul.f32 %v348_v36, %v741_v15  ;;  %v365_v44 = vmul.f32 %v348_v36, %v767_v12 }
 0x19f   :  { %v364_v45 = vmul.f32 %v348_v36, %v759_v30  ;;  %v291_v15 = vsel %vm118_vm7, %v257_v62, 0.0  ;;  %v297_v30 = vsel %vm118_vm7, %v259_v3, 0.0  ;;  %v309_v24 = vsel %vm118_vm7, %v263_v8, 0.0 }
 0x1a1   :  { %388 = vrot.lane.b32.xlu0 %v353_v39, %s570_s3  ;;  %386 = vrot.lane.b32.xlu1 %v352_v41, %s570_s3 }
 0x1a5   :  { %392 = vrot.lane.b32.xlu0 %v355_v42, %s570_s3  ;;  %390 = vrot.lane.b32.xlu1 %v354_v43, %s570_s3 }
 0x1a9   :  { %396 = vrot.lane.b32.xlu0 %v357_v16, %s570_s3  ;;  %394 = vrot.lane.b32.xlu1 %v356_v17, %s570_s3 }
 0x1ad   :  { %400 = vrot.lane.b32.xlu0 %v359_v18, %s570_s3  ;;  %398 = vrot.lane.b32.xlu1 %v358_v23, %s570_s3 }
 0x1b1   :  { %404 = vrot.lane.b32.xlu0 %v361_v29, %s570_s3  ;;  %402 = vrot.lane.b32.xlu1 %v360_v33, %s570_s3 }
 0x1b5   :  { %408 = vrot.lane.b32.xlu0 %v363_v40, %s570_s3  ;;  %406 = vrot.lane.b32.xlu1 %v362_v46, %s570_s3 }
 0x1b8   :  { %v266_v47 = vpop.xlane.xlu1 %265 }
 0x1b9   :  { %v313_v5 = vadd.f32 %v842_v52, %v266_v47  ;;  %412 = vrot.lane.b32.xlu0 %v365_v44, %s570_s3  ;;  %410 = vrot.lane.b32.xlu1 %v364_v45, %s570_s3 }
 0x1bb   :  { %330 = vst.msk [vmem:[%s1049_s4] sm:$0xff] %vm329_vm2, %v313_v5 }
 0x1bc   :  { %v275_v48 = vpop.xlane.xlu1 %274 }
 0x1bd   :  { %v316_v49 = vadd.f32 %v842_v52, %v275_v48 }
 0x1bf   :  { %333 = vst.msk [vmem:[%s1049_s4 + $0x18] sm:$0xff] %vm329_vm2, %v316_v49 }
 0x1c0   :  { %v281_v50 = vpop.xlane.xlu1 %280 }
 0x1c1   :  { %v318_v51 = vadd.f32 %v842_v52, %v281_v50 }
 0x1c3   :  { %335 = vst.msk [vmem:[%s1049_s4 + $0x28] sm:$0xff] %vm329_vm2, %v318_v51 }
 0x1c4   :  { %v287_v53 = vpop.xlane.xlu1 %286 }
 0x1c5   :  { %v320_v54 = vadd.f32 %v842_v52, %v287_v53 }
 0x1c7   :  { %337 = vst.msk [vmem:[%s1049_s4 + $0x38] sm:$0xff] %vm329_vm2, %v320_v54 }
 0x1d4   :  { %v269_v56 = vpop.xlane.xlu0 %268 }
 0x1d5   :  { %v314_v57 = vadd.f32 %v842_v52, %v269_v56 }
 0x1d7   :  { %331 = vst.msk [vmem:[%s1049_s4 + $0x8] sm:$0xff] %vm329_vm2, %v314_v57 }
 0x1d8   :  { %295 = vadd.xlane.f32.xlu0 %v294_v59  ;;  %v272_v61 = vpop.xlane.xlu0 %271 }
 0x1d9   :  { %v315_v0 = vadd.f32 %v842_v52, %v272_v61 }
 0x1db   :  { %332 = vst.msk [vmem:[%s1049_s4 + $0x10] sm:$0xff] %vm329_vm2, %v315_v0 }
 0x1dc   :  { %301 = vadd.xlane.f32.xlu0 %v300_v63  ;;  %v278_v2 = vpop.xlane.xlu0 %277 }
 0x1dd   :  { %v317_v58 = vadd.f32 %v842_v52, %v278_v2  ;;  %292 = vadd.xlane.f32.xlu1 %v291_v15 }
 0x1df   :  { %334 = vst.msk [vmem:[%s1049_s4 + $0x20] sm:$0xff] %vm329_vm2, %v317_v58 }
 0x1e0   :  { %307 = vadd.xlane.f32.xlu0 %v306_v6  ;;  %v284_v9 = vpop.xlane.xlu0 %283 }
 0x1e1   :  { %v319_v11 = vadd.f32 %v842_v52, %v284_v9  ;;  %298 = vadd.xlane.f32.xlu1 %v297_v30 }
 0x1e3   :  { %336 = vst.msk [vmem:[%s1049_s4 + $0x30] sm:$0xff] %vm329_vm2, %v319_v11 }
 0x1e4   :  { %v290_v7 = vpop.xlane.xlu0 %289 }
 0x1e5   :  { %v321_v14 = vadd.f32 %v842_v52, %v290_v7  ;;  %304 = vadd.xlane.f32.xlu1 %v303_v13 }
 0x1e7   :  { %338 = vst.msk [vmem:[%s1049_s4 + $0x40] sm:$0xff] %vm329_vm2, %v321_v14 }
 0x1e9   :  { %310 = vadd.xlane.f32.xlu1 %v309_v24 }
 0x20f   :  { %v383_v19 = vpop.permute.xlu0 %382  ;;  %v385_v20 = vpop.permute.xlu1 %384 }
 0x210   :  { %v430_v21 = vsel %vm118_vm7, %v383_v19, 0.0  ;;  %v433_v22 = vsel %vm118_vm7, %v385_v20, 0.0 }
 0x211   :  { %431 = vadd.xlane.f32.xlu0 %v430_v21  ;;  %434 = vadd.xlane.f32.xlu1 %v433_v22 }
 0x213   :  { %v389_v12 = vpop.permute.xlu0 %388  ;;  %v387_v4 = vpop.permute.xlu1 %386 }
 0x214   :  { %v439_v25 = vsel %vm118_vm7, %v389_v12, 0.0  ;;  %v436_v26 = vsel %vm118_vm7, %v387_v4, 0.0 }
 0x215   :  { %440 = vadd.xlane.f32.xlu1 %v439_v25  ;;  %437 = vadd.xlane.f32.xlu0 %v436_v26 }
 0x217   :  { %v393_v27 = vpop.permute.xlu0 %392  ;;  %v391_v28 = vpop.permute.xlu1 %390 }
 0x218   :  { %v445_v31 = vsel %vm118_vm7, %v393_v27, 0.0  ;;  %v442_v32 = vsel %vm118_vm7, %v391_v28, 0.0 }
 0x219   :  { %446 = vadd.xlane.f32.xlu1 %v445_v31  ;;  %443 = vadd.xlane.f32.xlu0 %v442_v32 }
 0x21b   :  { %v397_v34 = vpop.permute.xlu0 %396  ;;  %v395_v35 = vpop.permute.xlu1 %394 }
 0x21c   :  { %v451_v36 = vsel %vm118_vm7, %v397_v34, 0.0  ;;  %v448_v37 = vsel %vm118_vm7, %v395_v35, 0.0 }
 0x21d   :  { %452 = vadd.xlane.f32.xlu1 %v451_v36  ;;  %449 = vadd.xlane.f32.xlu0 %v448_v37 }
 0x21f   :  { %v401_v38 = vpop.permute.xlu0 %400  ;;  %v399_v39 = vpop.permute.xlu1 %398 }
 0x220   :  { %v457_v41 = vsel %vm118_vm7, %v401_v38, 0.0  ;;  %v454_v42 = vsel %vm118_vm7, %v399_v39, 0.0 }
 0x221   :  { %458 = vadd.xlane.f32.xlu1 %v457_v41  ;;  %455 = vadd.xlane.f32.xlu0 %v454_v42 }
 0x223   :  { %v405_v43 = vpop.permute.xlu0 %404  ;;  %v403_v16 = vpop.permute.xlu1 %402 }
 0x224   :  { %v463_v17 = vsel %vm118_vm7, %v405_v43, 0.0  ;;  %v460_v18 = vsel %vm118_vm7, %v403_v16, 0.0 }
 0x225   :  { %464 = vadd.xlane.f32.xlu1 %v463_v17  ;;  %461 = vadd.xlane.f32.xlu0 %v460_v18 }
 0x227   :  { %v409_v23 = vpop.permute.xlu0 %408  ;;  %v407_v29 = vpop.permute.xlu1 %406 }
 0x228   :  { %v469_v33 = vsel %vm118_vm7, %v409_v23, 0.0  ;;  %v466_v40 = vsel %vm118_vm7, %v407_v29, 0.0 }
 0x229   :  { %470 = vadd.xlane.f32.xlu1 %v469_v33  ;;  %467 = vadd.xlane.f32.xlu0 %v466_v40 }
 0x22b   :  { %v413_v46 = vpop.permute.xlu0 %412  ;;  %v411_v44 = vpop.permute.xlu1 %410 }
 0x22c   :  { %v475_v45 = vsel %vm118_vm7, %v413_v46, 0.0  ;;  %v472_v47 = vsel %vm118_vm7, %v411_v44, 0.0 }
 0x22d   :  { %476 = vadd.xlane.f32.xlu1 %v475_v45  ;;  %473 = vadd.xlane.f32.xlu0 %v472_v47 }
 0x265   :  { %v296_v5 = vpop.xlane.xlu0 %295 }
 0x266   :  { %v323_v48 = vadd.f32 %v842_v52, %v296_v5 }
 0x268   :  { %340 = vst.msk [vmem:[%s1049_s4 + $0x50] sm:$0xff] %vm329_vm2, %v323_v48 }
 0x269   :  { %v302_v49 = vpop.xlane.xlu0 %301 }
 0x26a   :  { %v325_v50 = vadd.f32 %v842_v52, %v302_v49  ;;  %v293_v51 = vpop.xlane.xlu1 %292 }
 0x26b   :  { %v322_v53 = vadd.f32 %v842_v52, %v293_v51 }
 0x26c   :  { %342 = vst.msk [vmem:[%s1049_s4 + $0x60] sm:$0xff] %vm329_vm2, %v325_v50 }
 0x26d   :  { %339 = vst.msk [vmem:[%s1049_s4 + $0x48] sm:$0xff] %vm329_vm2, %v322_v53  ;;  %v308_v54 = vpop.xlane.xlu0 %307 }
 0x26e   :  { %v327_v55 = vadd.f32 %v842_v52, %v308_v54  ;;  %v299_v56 = vpop.xlane.xlu1 %298 }
 0x26f   :  { %v324_v57 = vadd.f32 %v842_v52, %v299_v56 }
 0x270   :  { %344 = vst.msk [vmem:[%s1049_s4 + $0x70] sm:$0xff] %vm329_vm2, %v327_v55 }
 0x271   :  { %341 = vst.msk [vmem:[%s1049_s4 + $0x58] sm:$0xff] %vm329_vm2, %v324_v57 }
 0x272   :  { %v305_v59 = vpop.xlane.xlu1 %304 }
 0x273   :  { %v326_v60 = vadd.f32 %v842_v52, %v305_v59 }
 0x275   :  { %343 = vst.msk [vmem:[%s1049_s4 + $0x68] sm:$0xff] %vm329_vm2, %v326_v60 }
 0x276   :  { %v311_v61 = vpop.xlane.xlu1 %310 }
 0x277   :  { %v328_v62 = vadd.f32 %v842_v52, %v311_v61 }
 0x279   :  { %345 = vst.msk [vmem:[%s1049_s4 + $0x78] sm:$0xff] %vm329_vm2, %v328_v62 }
 0x29e   :  { %v432_v0 = vpop.xlane.xlu0 %431  ;;  %v435_v63 = vpop.xlane.xlu1 %434 }
 0x29f   :  { %v478_v1 = vadd.f32 %v432_v0, %v842_v52  ;;  %v479_v2 = vadd.f32 %v435_v63, %v842_v52 }
 0x2a1   :  { %495 = vst.msk [vmem:[%s1049_s4] sm:$0xff] %vm494_vm3, %v478_v1  ;;  %496 = vst.msk [vmem:[%s1049_s4 + $0x8] sm:$0xff] %vm494_vm3, %v479_v2 }
 0x2a2   :  { %v438_v15 = vpop.xlane.xlu0 %437  ;;  %v441_v3 = vpop.xlane.xlu1 %440 }
 0x2a3   :  { %v480_v58 = vadd.f32 %v438_v15, %v842_v52  ;;  %v481_v6 = vadd.f32 %v441_v3, %v842_v52 }
 0x2a5   :  { %497 = vst.msk [vmem:[%s1049_s4 + $0x10] sm:$0xff] %vm494_vm3, %v480_v58  ;;  %498 = vst.msk [vmem:[%s1049_s4 + $0x18] sm:$0xff] %vm494_vm3, %v481_v6 }
 0x2a6   :  { %v444_v9 = vpop.xlane.xlu0 %443  ;;  %v447_v30 = vpop.xlane.xlu1 %446 }
 0x2a7   :  { %v482_v10 = vadd.f32 %v444_v9, %v842_v52  ;;  %v483_v11 = vadd.f32 %v447_v30, %v842_v52 }
 0x2a9   :  { %499 = vst.msk [vmem:[%s1049_s4 + $0x20] sm:$0xff] %vm494_vm3, %v482_v10  ;;  %500 = vst.msk [vmem:[%s1049_s4 + $0x28] sm:$0xff] %vm494_vm3, %v483_v11 }
 0x2aa   :  { %v450_v7 = vpop.xlane.xlu0 %449  ;;  %v453_v13 = vpop.xlane.xlu1 %452 }
 0x2ab   :  { %v484_v8 = vadd.f32 %v450_v7, %v842_v52  ;;  %v485_v14 = vadd.f32 %v453_v13, %v842_v52 }
 0x2ad   :  { %501 = vst.msk [vmem:[%s1049_s4 + $0x30] sm:$0xff] %vm494_vm3, %v484_v8  ;;  %502 = vst.msk [vmem:[%s1049_s4 + $0x38] sm:$0xff] %vm494_vm3, %v485_v14 }
 0x2ae   :  { %v456_v24 = vpop.xlane.xlu0 %455  ;;  %v459_v19 = vpop.xlane.xlu1 %458 }
 0x2af   :  { %v486_v20 = vadd.f32 %v456_v24, %v842_v52  ;;  %v487_v21 = vadd.f32 %v459_v19, %v842_v52 }
 0x2b1   :  { %503 = vst.msk [vmem:[%s1049_s4 + $0x40] sm:$0xff] %vm494_vm3, %v486_v20  ;;  %504 = vst.msk [vmem:[%s1049_s4 + $0x48] sm:$0xff] %vm494_vm3, %v487_v21 }
 0x2b2   :  { %v462_v22 = vpop.xlane.xlu0 %461  ;;  %v465_v12 = vpop.xlane.xlu1 %464 }
 0x2b3   :  { %v488_v4 = vadd.f32 %v462_v22, %v842_v52  ;;  %v489_v25 = vadd.f32 %v465_v12, %v842_v52 }
 0x2b5   :  { %505 = vst.msk [vmem:[%s1049_s4 + $0x50] sm:$0xff] %vm494_vm3, %v488_v4  ;;  %506 = vst.msk [vmem:[%s1049_s4 + $0x58] sm:$0xff] %vm494_vm3, %v489_v25 }
 0x2b6   :  { %v468_v26 = vpop.xlane.xlu0 %467  ;;  %v471_v27 = vpop.xlane.xlu1 %470 }
 0x2b7   :  { %v490_v28 = vadd.f32 %v468_v26, %v842_v52  ;;  %v491_v31 = vadd.f32 %v471_v27, %v842_v52 }
 0x2b9   :  { %507 = vst.msk [vmem:[%s1049_s4 + $0x60] sm:$0xff] %vm494_vm3, %v490_v28  ;;  %508 = vst.msk [vmem:[%s1049_s4 + $0x68] sm:$0xff] %vm494_vm3, %v491_v31 }
 0x2ba   :  { %v474_v32 = vpop.xlane.xlu0 %473  ;;  %v477_v34 = vpop.xlane.xlu1 %476 }
 0x2bb   :  { %v492_v35 = vadd.f32 %v474_v32, %v842_v52  ;;  %v493_v36 = vadd.f32 %v477_v34, %v842_v52 }
 0x2bd   :  { %509 = vst.msk [vmem:[%s1049_s4 + $0x70] sm:$0xff] %vm494_vm3, %v492_v35  ;;  %510 = vst.msk [vmem:[%s1049_s4 + $0x78] sm:$0xff] %vm494_vm3, %v493_v36 }

// kernel: dgi_forward.4
= control target key start
LH: loop header
LB: loop body
LE: loop exit
PB: predicated region body
PF: predicated region fallthrough
CT: control target
= control target key end

     0   :  { %vm23_vm0 = vcmask 523264   ;;  %v531_v1 = vmov 0.0   ;;  %s743_s1 = inlined_call_operand.vmem [shape: bf16[128,64], index: 1, kind: input, shape index: {}]   ;;  %s744_s0 = inlined_call_operand.vmem [shape: bf16[128,128], index: 0, kind: input, shape index: {}]   ;;  %s745_s2 = inlined_call_operand.vmem [shape: f32[1,64], index: 2, kind: input, shape index: {}]   ;;  %s746_s3 = inlined_call_operand.<no memory space> [shape: f32[1], index: 3, kind: input, shape index: {}]   ;;  %s747_s4 = inlined_call_operand.vmem [shape: f32[128,64], index: 4, kind: output, shape index: {}]  }
   0x1   :  { %v515_v0 = vld [vmem:[%s743_s1] sm:$0xff]   ;;  %26 = vst.msk [vmem:[#allocation2 + $0x10] sm:$0xff] %vm23_vm0, %v531_v1  ;;  %24 = vst.msk [vmem:[#allocation2] sm:$0xff] %vm23_vm0, %v531_v1  ;;  %v516_v2 = vld [vmem:[%s743_s1 + $0x8] sm:$0xff]   ;;  %v637_v57 = vstv %s746_s3 }
   0x2   :  { %25 = vst.msk [vmem:[#allocation2 + $0x8] sm:$0xff] %vm23_vm0, %v531_v1  ;;  %27 = vst.msk [vmem:[#allocation2 + $0x18] sm:$0xff] %vm23_vm0, %v531_v1  ;;  %466 = vmatprep.subr.bf16.mxu0 %v515_v0  ;;  %498 = vmatprep.subr.bf16.mxu1 %v515_v0  ;;  %v517_v3 = vld [vmem:[%s743_s1 + $0x10] sm:$0xff]   ;;  %v518_v4 = vld [vmem:[%s743_s1 + $0x18] sm:$0xff]  }
   0x3   :  { %28 = vst.msk [vmem:[#allocation2 + $0x20] sm:$0xff] %vm23_vm0, %v531_v1  ;;  %29 = vst.msk [vmem:[#allocation2 + $0x28] sm:$0xff] %vm23_vm0, %v531_v1  ;;  %467 = vmatpush3.bf16.msra.mxu0 %v515_v0  ;;  %506 = vmatpush3.bf16.msra.mxu1 %v515_v0  ;;  %v523_v5 = vld [vmem:[%s744_s0] sm:$0xff]   ;;  %v520_v8 = vld [vmem:[%s743_s1 + $0x28] sm:$0xff]  }
   0x4   :  { %30 = vst.msk [vmem:[#allocation2 + $0x30] sm:$0xff] %vm23_vm0, %v531_v1  ;;  %31 = vst.msk [vmem:[#allocation2 + $0x38] sm:$0xff] %vm23_vm0, %v531_v1  ;;  %468 = vmatprep.subr.bf16.mxu0 %v516_v2  ;;  %499 = vmatprep.subr.bf16.mxu1 %v516_v2  ;;  %v524_v6 = vld [vmem:[%s744_s0 + $0x20] sm:$0xff]   ;;  %v521_v9 = vld [vmem:[%s743_s1 + $0x30] sm:$0xff]  }
   0x5   :  { %32 = vst.msk [vmem:[#allocation2 + $0x40] sm:$0xff] %vm23_vm0, %v531_v1  ;;  %33 = vst.msk [vmem:[#allocation2 + $0x48] sm:$0xff] %vm23_vm0, %v531_v1  ;;  %482 = vmatprep.mubr.bf16.mxu0 %v523_v5  ;;  %v519_v7 = vld [vmem:[%s743_s1 + $0x20] sm:$0xff]   ;;  %490 = vmatprep.mubr.bf16.mxu1 %v524_v6  ;;  %v522_v10 = vld [vmem:[%s743_s1 + $0x38] sm:$0xff]  }
   0x6   :  { %34 = vst.msk [vmem:[#allocation2 + $0x50] sm:$0xff] %vm23_vm0, %v531_v1  ;;  %35 = vst.msk [vmem:[#allocation2 + $0x58] sm:$0xff] %vm23_vm0, %v531_v1  ;;  %v525_v11 = vld [vmem:[%s744_s0 + $0x8] sm:$0xff]   ;;  %v527_v13 = vld [vmem:[%s744_s0 + $0x10] sm:$0xff]  }
   0x7   :  { %36 = vst.msk [vmem:[#allocation2 + $0x60] sm:$0xff] %vm23_vm0, %v531_v1  ;;  %37 = vst.msk [vmem:[#allocation2 + $0x68] sm:$0xff] %vm23_vm0, %v531_v1  ;;  %469 = vmatpush3.bf16.msra.mxu0 %v516_v2  ;;  %507 = vmatpush3.bf16.msra.mxu1 %v516_v2  ;;  %v526_v12 = vld [vmem:[%s744_s0 + $0x28] sm:$0xff]   ;;  %v528_v14 = vld [vmem:[%s744_s0 + $0x30] sm:$0xff]  }
   0x8   :  { %38 = vst.msk [vmem:[#allocation2 + $0x70] sm:$0xff] %vm23_vm0, %v531_v1  ;;  %39 = vst.msk [vmem:[#allocation2 + $0x78] sm:$0xff] %vm23_vm0, %v531_v1  ;;  %470 = vmatprep.subr.bf16.mxu0 %v517_v3  ;;  %500 = vmatprep.subr.bf16.mxu1 %v517_v3  ;;  %v529_v15 = vld [vmem:[%s744_s0 + $0x18] sm:$0xff]   ;;  %v63_v17 = vld [vmem:[#allocation2 + $0x10] sm:$0xff] }
   0x9   :  { %v530_v16 = vld [vmem:[%s744_s0 + $0x38] sm:$0xff]   ;;  %v61_v19 = vld [vmem:[#allocation2] sm:$0xff]  ;;  %v62_v29 = vld [vmem:[#allocation2 + $0x8] sm:$0xff] }
   0xa   :  { %v64_v23 = vld [vmem:[#allocation2 + $0x18] sm:$0xff]  ;;  %v65_v43 = vld [vmem:[#allocation2 + $0x20] sm:$0xff]  ;;  %v66_v54 = vld [vmem:[#allocation2 + $0x28] sm:$0xff] }
   0xb   :  { %471 = vmatpush3.bf16.msra.mxu0 %v517_v3  ;;  %508 = vmatpush3.bf16.msra.mxu1 %v517_v3  ;;  %v67_v41 = vld [vmem:[#allocation2 + $0x30] sm:$0xff]  ;;  %v632_v45 = vld [vmem:[%s745_s2] ss:$0 sm:$0xff]  ;;  %v68_v48 = vld [vmem:[#allocation2 + $0x38] sm:$0xff] }
   0xc   :  { %472 = vmatprep.subr.bf16.mxu0 %v518_v4  ;;  %501 = vmatprep.subr.bf16.mxu1 %v518_v4  ;;  %v69_v20 = vld [vmem:[#allocation2 + $0x40] sm:$0xff]  ;;  %v70_v30 = vld [vmem:[#allocation2 + $0x48] sm:$0xff] }
   0xd   :  { %v71_v18 = vld [vmem:[#allocation2 + $0x50] sm:$0xff]  ;;  %v72_v24 = vld [vmem:[#allocation2 + $0x58] sm:$0xff] }
   0xe   :  { %v73_v44 = vld [vmem:[#allocation2 + $0x60] sm:$0xff]  ;;  %v74_v55 = vld [vmem:[#allocation2 + $0x68] sm:$0xff] }
   0xf   :  { %473 = vmatpush3.bf16.msra.mxu0 %v518_v4  ;;  %509 = vmatpush3.bf16.msra.mxu1 %v518_v4  ;;  %v75_v42 = vld [vmem:[#allocation2 + $0x70] sm:$0xff]  ;;  %v76_v49 = vld [vmem:[#allocation2 + $0x78] sm:$0xff] }
  0x10   :  { %474 = vmatprep.subr.bf16.mxu0 %v519_v7  ;;  %502 = vmatprep.subr.bf16.mxu1 %v519_v7 }
  0x13   :  { %475 = vmatpush3.bf16.msra.mxu0 %v519_v7  ;;  %510 = vmatpush3.bf16.msra.mxu1 %v519_v7 }
  0x14   :  { %476 = vmatprep.subr.bf16.mxu0 %v520_v8  ;;  %503 = vmatprep.subr.bf16.mxu1 %v520_v8 }
  0x17   :  { %477 = vmatpush3.bf16.msra.mxu0 %v520_v8  ;;  %511 = vmatpush3.bf16.msra.mxu1 %v520_v8 }
  0x18   :  { %478 = vmatprep.subr.bf16.mxu0 %v521_v9  ;;  %504 = vmatprep.subr.bf16.mxu1 %v521_v9 }
  0x1b   :  { %479 = vmatpush3.bf16.msra.mxu0 %v521_v9  ;;  %512 = vmatpush3.bf16.msra.mxu1 %v521_v9 }
  0x1c   :  { %480 = vmatprep.subr.bf16.mxu0 %v522_v10  ;;  %505 = vmatprep.subr.bf16.mxu1 %v522_v10 }
  0x1f   :  { %481 = vmatpush3.bf16.msra.mxu0 %v522_v10  ;;  %513 = vmatpush3.bf16.msra.mxu1 %v522_v10 }
  0x22   :  { %483 = vmatmul.mubr.bf16.vlgmr.msra.gmra.mrb[0].mxu0 %v525_v11  ;;  %491 = vmatmul.mubr.bf16.vlgmr.msra.gmra.mrb[0].mxu1 %v526_v12 }
  0x23   :  { %486 = vmatprep.mubr.bf16.mxu0 %v527_v13  ;;  %494 = vmatprep.mubr.bf16.mxu1 %v528_v14 }
  0x2a   :  { %487 = vmatmul.mubr.bf16.gmra.mrb[4].mxu0 %v529_v15  ;;  %495 = vmatmul.mubr.bf16.gmra.mrb[4].mxu1 %v530_v16 }
  0xf5   :  { %v484_v21 = vpop.f32.mrb[0].mxu0  ;;  %v492_v22 = vpop.f32.mrb[0].mxu1 }
  0xf6   :  { %v288_v25 = vadd.f32 %v484_v21, %v63_v17  ;;  %v296_v26 = vadd.f32 %v492_v22, %v71_v18  ;;  %v223_v27 = vpop.f32.mrb[1].mxu0  ;;  %v255_v28 = vpop.f32.mrb[1].mxu1 }
  0xf7   :  { %v286_v31 = vadd.f32 %v223_v27, %v61_v19  ;;  %v294_v32 = vadd.f32 %v255_v28, %v69_v20  ;;  %v485_v33 = vpop.f32.mrb[2].mxu0  ;;  %v493_v34 = vpop.f32.mrb[2].mxu1 }
  0xf8   :  { %305 = vst.msk [vmem:[#allocation2 + $0x10] sm:$0xff] %vm23_vm0, %v288_v25  ;;  %313 = vst.msk [vmem:[#allocation2 + $0x50] sm:$0xff] %vm23_vm0, %v296_v26  ;;  %v289_v35 = vadd.f32 %v485_v33, %v64_v23  ;;  %v297_v36 = vadd.f32 %v493_v34, %v72_v24  ;;  %v226_v37 = vpop.f32.mrb[3].mxu0  ;;  %v258_v38 = vpop.f32.mrb[3].mxu1 }
  0xf9   :  { %303 = vst.msk [vmem:[#allocation2] sm:$0xff] %vm23_vm0, %v286_v31  ;;  %311 = vst.msk [vmem:[#allocation2 + $0x40] sm:$0xff] %vm23_vm0, %v294_v32  ;;  %v287_v39 = vadd.f32 %v226_v37, %v62_v29  ;;  %v295_v40 = vadd.f32 %v258_v38, %v70_v30 }
  0xfa   :  { %306 = vst.msk [vmem:[#allocation2 + $0x18] sm:$0xff] %vm23_vm0, %v289_v35  ;;  %314 = vst.msk [vmem:[#allocation2 + $0x58] sm:$0xff] %vm23_vm0, %v297_v36 }
  0xfb   :  { %304 = vst.msk [vmem:[#allocation2 + $0x8] sm:$0xff] %vm23_vm0, %v287_v39  ;;  %312 = vst.msk [vmem:[#allocation2 + $0x48] sm:$0xff] %vm23_vm0, %v295_v40 }
  0xfd   :  { %v488_v46 = vpop.f32.mrb[4].mxu0  ;;  %v496_v47 = vpop.f32.mrb[4].mxu1 }
  0xfe   :  { %v292_v50 = vadd.f32 %v488_v46, %v67_v41  ;;  %v300_v51 = vadd.f32 %v496_v47, %v75_v42  ;;  %v239_v52 = vpop.f32.mrb[5].mxu0  ;;  %v271_v53 = vpop.f32.mrb[5].mxu1 }
  0xff   :  { %v325_v56 = vld [vmem:[#allocation2 + $0x10] sm:$0xff]  ;;  %v290_v59 = vadd.f32 %v239_v52, %v65_v43  ;;  %v298_v60 = vadd.f32 %v271_v53, %v73_v44  ;;  %v489_v61 = vpop.f32.mrb[6].mxu0  ;;  %v497_v62 = vpop.f32.mrb[6].mxu1 }
 0x100   :  { %v333_v58 = vld [vmem:[#allocation2 + $0x50] sm:$0xff]  ;;  %v348_v63 = vadd.f32 %v632_v45, %v325_v56  ;;  %v323_v1 = vld [vmem:[#allocation2] sm:$0xff]  ;;  %309 = vst.msk [vmem:[#allocation2 + $0x30] sm:$0xff] %vm23_vm0, %v292_v50  ;;  %317 = vst.msk [vmem:[#allocation2 + $0x70] sm:$0xff] %vm23_vm0, %v300_v51  ;;  %v293_v3 = vadd.f32 %v489_v61, %v68_v48  ;;  %v301_v4 = vadd.f32 %v497_v62, %v76_v49  ;;  %v242_v5 = vpop.f32.mrb[7].mxu0  ;;  %v274_v6 = vpop.f32.mrb[7].mxu1 }
 0x101   :  { %v356_v0 = vadd.f32 %v632_v45, %v333_v58  ;;  %v331_v2 = vld [vmem:[#allocation2 + $0x40] sm:$0xff]  ;;  %v346_v7 = vadd.f32 %v632_v45, %v323_v1  ;;  %v326_v9 = vld [vmem:[#allocation2 + $0x18] sm:$0xff]  ;;  %307 = vst.msk [vmem:[#allocation2 + $0x20] sm:$0xff] %vm23_vm0, %v290_v59  ;;  %315 = vst.msk [vmem:[#allocation2 + $0x60] sm:$0xff] %vm23_vm0, %v298_v60  ;;  %v291_v11 = vadd.f32 %v242_v5, %v66_v54 }
 0x102   :  { %v354_v8 = vadd.f32 %v632_v45, %v331_v2  ;;  %v334_v10 = vld [vmem:[#allocation2 + $0x58] sm:$0xff]  ;;  %v299_v12 = vadd.f32 %v274_v6, %v74_v55  ;;  %vm364_vm1 = vcmp.gt.f32.partialorder %v348_v63, 0.0  ;;  %v381_v13 = vmul.f32 %v637_v57, %v348_v63  ;;  %v324_v15 = vld [vmem:[#allocation2 + $0x8] sm:$0xff]  ;;  %310 = vst.msk [vmem:[#allocation2 + $0x38] sm:$0xff] %vm23_vm0, %v293_v3  ;;  %318 = vst.msk [vmem:[#allocation2 + $0x78] sm:$0xff] %vm23_vm0, %v301_v4 }
 0x103   :  { %vm372_vm2 = vcmp.gt.f32.partialorder %v356_v0, 0.0  ;;  %v389_v14 = vmul.f32 %v637_v57, %v356_v0  ;;  %v332_v16 = vld [vmem:[#allocation2 + $0x48] sm:$0xff]  ;;  %vm362_vm3 = vcmp.gt.f32.partialorder %v346_v7, 0.0  ;;  %v379_v17 = vmul.f32 %v637_v57, %v346_v7  ;;  %308 = vst.msk [vmem:[#allocation2 + $0x28] sm:$0xff] %vm23_vm0, %v291_v11 }
 0x104   :  { %vm370_vm4 = vcmp.gt.f32.partialorder %v354_v8, 0.0  ;;  %v387_v18 = vmul.f32 %v637_v57, %v354_v8  ;;  %316 = vst.msk [vmem:[#allocation2 + $0x68] sm:$0xff] %vm23_vm0, %v299_v12  ;;  %v397_v19 = vsel %vm364_vm1, %v348_v63, %v381_v13  ;;  %v349_v21 = vadd.f32 %v632_v45, %v326_v9 }
 0x105   :  { %v405_v20 = vsel %vm372_vm2, %v356_v0, %v389_v14  ;;  %v357_v22 = vadd.f32 %v632_v45, %v334_v10  ;;  %413 = vst.msk [vmem:[%s747_s4 + $0x10] sm:$0xff] %vm23_vm0, %v397_v19  ;;  %v395_v23 = vsel %vm362_vm3, %v346_v7, %v379_v17  ;;  %v347_v25 = vadd.f32 %v632_v45, %v324_v15 }
 0x106   :  { %421 = vst.msk [vmem:[%s747_s4 + $0x50] sm:$0xff] %vm23_vm0, %v405_v20  ;;  %v403_v24 = vsel %vm370_vm4, %v354_v8, %v387_v18  ;;  %v355_v26 = vadd.f32 %v632_v45, %v332_v16  ;;  %411 = vst.msk [vmem:[%s747_s4] sm:$0xff] %vm23_vm0, %v395_v23  ;;  %vm365_vm5 = vcmp.gt.f32.partialorder %v349_v21, 0.0  ;;  %v382_v27 = vmul.f32 %v637_v57, %v349_v21 }
 0x107   :  { %419 = vst.msk [vmem:[%s747_s4 + $0x40] sm:$0xff] %vm23_vm0, %v403_v24  ;;  %vm373_vm6 = vcmp.gt.f32.partialorder %v357_v22, 0.0  ;;  %v390_v28 = vmul.f32 %v637_v57, %v357_v22  ;;  %vm363_vm7 = vcmp.gt.f32.partialorder %v347_v25, 0.0  ;;  %v380_v29 = vmul.f32 %v637_v57, %v347_v25  ;;  %v329_v31 = vld [vmem:[#allocation2 + $0x30] sm:$0xff] }
 0x108   :  { %vm371_vm8 = vcmp.gt.f32.partialorder %v355_v26, 0.0  ;;  %v388_v30 = vmul.f32 %v637_v57, %v355_v26  ;;  %v337_v32 = vld [vmem:[#allocation2 + $0x70] sm:$0xff]  ;;  %v398_v33 = vsel %vm365_vm5, %v349_v21, %v382_v27  ;;  %v352_v35 = vadd.f32 %v632_v45, %v329_v31  ;;  %v327_v37 = vld [vmem:[#allocation2 + $0x20] sm:$0xff] }
 0x109   :  { %v406_v34 = vsel %vm373_vm6, %v357_v22, %v390_v28  ;;  %v360_v36 = vadd.f32 %v632_v45, %v337_v32  ;;  %v335_v38 = vld [vmem:[#allocation2 + $0x60] sm:$0xff]  ;;  %414 = vst.msk [vmem:[%s747_s4 + $0x18] sm:$0xff] %vm23_vm0, %v398_v33  ;;  %v396_v39 = vsel %vm363_vm7, %v347_v25, %v380_v29  ;;  %v350_v41 = vadd.f32 %v632_v45, %v327_v37  ;;  %v330_v43 = vld [vmem:[#allocation2 + $0x38] sm:$0xff] }
 0x10a   :  { %422 = vst.msk [vmem:[%s747_s4 + $0x58] sm:$0xff] %vm23_vm0, %v406_v34  ;;  %v404_v40 = vsel %vm371_vm8, %v355_v26, %v388_v30  ;;  %v358_v42 = vadd.f32 %v632_v45, %v335_v38  ;;  %v338_v44 = vld [vmem:[#allocation2 + $0x78] sm:$0xff]  ;;  %412 = vst.msk [vmem:[%s747_s4 + $0x8] sm:$0xff] %vm23_vm0, %v396_v39  ;;  %vm368_vm9 = vcmp.gt.f32.partialorder %v352_v35, 0.0  ;;  %v385_v46 = vmul.f32 %v637_v57, %v352_v35  ;;  %v328_v48 = vld [vmem:[#allocation2 + $0x28] sm:$0xff] }
 0x10b   :  { %420 = vst.msk [vmem:[%s747_s4 + $0x48] sm:$0xff] %vm23_vm0, %v404_v40  ;;  %vm376_vm10 = vcmp.gt.f32.partialorder %v360_v36, 0.0  ;;  %v393_v47 = vmul.f32 %v637_v57, %v360_v36  ;;  %v336_v49 = vld [vmem:[#allocation2 + $0x68] sm:$0xff]  ;;  %vm366_vm11 = vcmp.gt.f32.partialorder %v350_v41, 0.0  ;;  %v383_v50 = vmul.f32 %v637_v57, %v350_v41 }
 0x10c   :  { %vm374_vm12 = vcmp.gt.f32.partialorder %v358_v42, 0.0  ;;  %v391_v51 = vmul.f32 %v637_v57, %v358_v42  ;;  %v401_v52 = vsel %vm368_vm9, %v352_v35, %v385_v46  ;;  %v353_v54 = vadd.f32 %v632_v45, %v330_v43 }
 0x10d   :  { %v409_v53 = vsel %vm376_vm10, %v360_v36, %v393_v47  ;;  %v361_v55 = vadd.f32 %v632_v45, %v338_v44  ;;  %417 = vst.msk [vmem:[%s747_s4 + $0x30] sm:$0xff] %vm23_vm0, %v401_v52  ;;  %v399_v56 = vsel %vm366_vm11, %v350_v41, %v383_v50  ;;  %v351_v59 = vadd.f32 %v632_v45, %v328_v48 }
 0x10e   :  { %425 = vst.msk [vmem:[%s747_s4 + $0x70] sm:$0xff] %vm23_vm0, %v409_v53  ;;  %v407_v58 = vsel %vm374_vm12, %v358_v42, %v391_v51  ;;  %v359_v60 = vadd.f32 %v632_v45, %v336_v49  ;;  %415 = vst.msk [vmem:[%s747_s4 + $0x20] sm:$0xff] %vm23_vm0, %v399_v56  ;;  %vm369_vm13 = vcmp.gt.f32.partialorder %v353_v54, 0.0  ;;  %v386_v61 = vmul.f32 %v637_v57, %v353_v54 }
 0x10f   :  { %423 = vst.msk [vmem:[%s747_s4 + $0x60] sm:$0xff] %vm23_vm0, %v407_v58  ;;  %vm377_vm14 = vcmp.gt.f32.partialorder %v361_v55, 0.0  ;;  %v394_v62 = vmul.f32 %v637_v57, %v361_v55  ;;  %vm367_vm15 = vcmp.gt.f32.partialorder %v351_v59, 0.0  ;;  %v384_v63 = vmul.f32 %v637_v57, %v351_v59 }
 0x110   :  { %vm375_vm1 = vcmp.gt.f32.partialorder %v359_v60, 0.0  ;;  %v392_v45 = vmul.f32 %v637_v57, %v359_v60  ;;  %v402_v0 = vsel %vm369_vm13, %v353_v54, %v386_v61 }
 0x111   :  { %v410_v1 = vsel %vm377_vm14, %v361_v55, %v394_v62  ;;  %418 = vst.msk [vmem:[%s747_s4 + $0x38] sm:$0xff] %vm23_vm0, %v402_v0  ;;  %v400_v2 = vsel %vm367_vm15, %v351_v59, %v384_v63 }
 0x112   :  { %426 = vst.msk [vmem:[%s747_s4 + $0x78] sm:$0xff] %vm23_vm0, %v410_v1  ;;  %v408_v3 = vsel %vm375_vm1, %v359_v60, %v392_v45  ;;  %416 = vst.msk [vmem:[%s747_s4 + $0x28] sm:$0xff] %vm23_vm0, %v400_v2 }
 0x113   :  { %424 = vst.msk [vmem:[%s747_s4 + $0x68] sm:$0xff] %vm23_vm0, %v408_v3 }

// kernel: dgi_forward.3
= control target key start
LH: loop header
LB: loop body
LE: loop exit
PB: predicated region body
PF: predicated region fallthrough
CT: control target
= control target key end

     0   :  { %vm32_vm0 = vcmask 130048   ;;  %vm499_vm1 = vcmask 257024   ;;  %vm612_vm2 = vcmask 519424   ;;  %s1129_s2 = inlined_call_operand.vmem [shape: f32[16,32], index: 2, kind: input, shape index: {}]   ;;  %s1130_s1 = inlined_call_operand.vmem [shape: f32[128,16], index: 1, kind: input, shape index: {}]   ;;  %s1131_s0 = inlined_call_operand.vmem [shape: f32[128,16], index: 0, kind: input, shape index: {}]   ;;  %s1132_s3 = inlined_call_operand.vmem [shape: bf16[128,64], index: 3, kind: output, shape index: {}]  }
   0x1   :  { %v14_v0 = vld [vmem:[%s1129_s2] sm:$0xff]  ;;  %v15_v1 = vld [vmem:[%s1129_s2 + $0x8] sm:$0xff]  ;;  %v228_v5 = vld [vmem:[%s1130_s1 + $0x10] sm:$0xff] }
   0x2   :  { %v226_v2 = vld [vmem:[%s1130_s1] sm:$0xff]  ;;  %v821_v3 = vpack.c.bf16 %v15_v1, %v14_v0  ;;  %v227_v4 = vld [vmem:[%s1130_s1 + $0x8] sm:$0xff]  ;;  %v18_v8 = vld [vmem:[%s1131_s0 + $0x10] sm:$0xff] }
   0x3   :  { %797 = vmatprep.mubr.msk.f32.mxu1 %vm32_vm0, %v226_v2  ;;  %v16_v6 = vld [vmem:[%s1131_s0] sm:$0xff]  ;;  %v17_v7 = vld [vmem:[%s1131_s0 + $0x8] sm:$0xff]  ;;  %v229_v9 = vld [vmem:[%s1130_s1 + $0x18] sm:$0xff] }
   0x4   :  { %826 = vmatprep.subr.bf16.mxu1 %v821_v3  ;;  %822 = vmatprep.subr.bf16.mxu0 %v821_v3  ;;  %v230_v10 = vld [vmem:[%s1130_s1 + $0x20] sm:$0xff]  ;;  %v19_v11 = vld [vmem:[%s1131_s0 + $0x18] sm:$0xff]  ;;  %v231_v13 = vld [vmem:[%s1130_s1 + $0x28] sm:$0xff] }
   0x5   :  { %828 = vmatpush3.bf16.msra.mxu1 %v821_v3  ;;  %824 = vmatpush3.bf16.msra.mxu0 %v821_v3  ;;  %v20_v12 = vld [vmem:[%s1131_s0 + $0x20] sm:$0xff]  ;;  %v232_v14 = vld [vmem:[%s1130_s1 + $0x30] sm:$0xff]  ;;  %v21_v15 = vld [vmem:[%s1131_s0 + $0x28] sm:$0xff] }
   0x6   :  { %769 = vmatprep.mubr.msk.f32.mxu0 %vm32_vm0, %v16_v6  ;;  %v22_v16 = vld [vmem:[%s1131_s0 + $0x30] sm:$0xff]  ;;  %v233_v17 = vld [vmem:[%s1130_s1 + $0x38] sm:$0xff]  ;;  %v234_v18 = vld [vmem:[%s1130_s1 + $0x40] sm:$0xff] }
   0x7   :  { %v23_v19 = vld [vmem:[%s1131_s0 + $0x38] sm:$0xff]  ;;  %v24_v20 = vld [vmem:[%s1131_s0 + $0x40] sm:$0xff]  ;;  %v235_v21 = vld [vmem:[%s1130_s1 + $0x48] sm:$0xff] }
   0x8   :  { %798 = vmatmul.mubr.msk.f32.vlgmr.msra.gmra.mrb[0].mxu1 %vm32_vm0, %v227_v4  ;;  %770 = vmatmul.mubr.msk.f32.vlgmr.msra.gmra.mrb[0].mxu0 %vm32_vm0, %v17_v7  ;;  %v236_v22 = vld [vmem:[%s1130_s1 + $0x50] sm:$0xff]  ;;  %v25_v23 = vld [vmem:[%s1131_s0 + $0x48] sm:$0xff]  ;;  %v237_v25 = vld [vmem:[%s1130_s1 + $0x58] sm:$0xff] }
   0x9   :  { %800 = vmatprep.mubr.msk.f32.mxu1 %vm32_vm0, %v228_v5  ;;  %772 = vmatprep.mubr.msk.f32.mxu0 %vm32_vm0, %v18_v8  ;;  %v26_v24 = vld [vmem:[%s1131_s0 + $0x50] sm:$0xff]  ;;  %v238_v26 = vld [vmem:[%s1130_s1 + $0x60] sm:$0xff]  ;;  %v27_v27 = vld [vmem:[%s1131_s0 + $0x58] sm:$0xff] }
   0xa   :  { %v28_v28 = vld [vmem:[%s1131_s0 + $0x60] sm:$0xff]  ;;  %v239_v29 = vld [vmem:[%s1130_s1 + $0x68] sm:$0xff]  ;;  %v240_v30 = vld [vmem:[%s1130_s1 + $0x70] sm:$0xff] }
   0xb   :  { %v29_v31 = vld [vmem:[%s1131_s0 + $0x68] sm:$0xff]  ;;  %v30_v32 = vld [vmem:[%s1131_s0 + $0x70] sm:$0xff]  ;;  %v241_v33 = vld [vmem:[%s1130_s1 + $0x78] sm:$0xff]  ;;  %s830_s1 = smov 32  }
   0xc   :  { %801 = vmatmul.mubr.msk.f32.gmra.mrb[2].mxu1 %vm32_vm0, %v229_v9  ;;  %773 = vmatmul.mubr.msk.f32.gmra.mrb[2].mxu0 %vm32_vm0, %v19_v11  ;;  %v31_v34 = vld [vmem:[%s1131_s0 + $0x78] sm:$0xff] }
   0xd   :  { %803 = vmatprep.mubr.msk.f32.mxu1 %vm32_vm0, %v230_v10  ;;  %775 = vmatprep.mubr.msk.f32.mxu0 %vm32_vm0, %v20_v12 }
  0x10   :  { %804 = vmatmul.mubr.msk.f32.gmra.mrb[4].mxu1 %vm32_vm0, %v231_v13  ;;  %776 = vmatmul.mubr.msk.f32.gmra.mrb[4].mxu0 %vm32_vm0, %v21_v15 }
  0x11   :  { %806 = vmatprep.mubr.msk.f32.mxu1 %vm32_vm0, %v232_v14  ;;  %778 = vmatprep.mubr.msk.f32.mxu0 %vm32_vm0, %v22_v16 }
  0x14   :  { %807 = vmatmul.mubr.msk.f32.gmra.mrb[6].mxu1 %vm32_vm0, %v233_v17  ;;  %779 = vmatmul.mubr.msk.f32.gmra.mrb[6].mxu0 %vm32_vm0, %v23_v19 }
  0x15   :  { %809 = vmatprep.mubr.msk.f32.mxu1 %vm32_vm0, %v234_v18  ;;  %781 = vmatprep.mubr.msk.f32.mxu0 %vm32_vm0, %v24_v20 }
  0x18   :  { %810 = vmatmul.mubr.msk.f32.gmra.mrb[8].mxu1 %vm32_vm0, %v235_v21  ;;  %782 = vmatmul.mubr.msk.f32.gmra.mrb[8].mxu0 %vm32_vm0, %v25_v23 }
  0x19   :  { %812 = vmatprep.mubr.msk.f32.mxu1 %vm32_vm0, %v236_v22  ;;  %784 = vmatprep.mubr.msk.f32.mxu0 %vm32_vm0, %v26_v24 }
  0x1c   :  { %813 = vmatmul.mubr.msk.f32.gmra.mrb[10].mxu1 %vm32_vm0, %v237_v25  ;;  %785 = vmatmul.mubr.msk.f32.gmra.mrb[10].mxu0 %vm32_vm0, %v27_v27 }
  0x1d   :  { %815 = vmatprep.mubr.msk.f32.mxu1 %vm32_vm0, %v238_v26  ;;  %787 = vmatprep.mubr.msk.f32.mxu0 %vm32_vm0, %v28_v28 }
  0x20   :  { %816 = vmatmul.mubr.msk.f32.gmra.mrb[12].mxu1 %vm32_vm0, %v239_v29  ;;  %788 = vmatmul.mubr.msk.f32.gmra.mrb[12].mxu0 %vm32_vm0, %v29_v31 }
  0x21   :  { %818 = vmatprep.mubr.msk.f32.mxu1 %vm32_vm0, %v240_v30  ;;  %790 = vmatprep.mubr.msk.f32.mxu0 %vm32_vm0, %v30_v32 }
  0x24   :  { %819 = vmatmul.mubr.msk.f32.gmra.mrb[14].mxu1 %vm32_vm0, %v241_v33  ;;  %791 = vmatmul.mubr.msk.f32.gmra.mrb[14].mxu0 %vm32_vm0, %v31_v34 }
  0xdb   :  { %v799_v35 = vpop.f32.mrb[0].mxu1  ;;  %v771_v38 = vpop.f32.mrb[0].mxu0 }
  0xdc   :  { %v714_v36 = vpack.c.bf16 %v799_v35, %v799_v35  ;;  %v356_v37 = vpop.f32.mrb[1].mxu1  ;;  %v698_v39 = vpack.c.bf16 %v771_v38, %v771_v38  ;;  %v147_v40 = vpop.f32.mrb[1].mxu0 }
  0xdd   :  { %v697_v41 = vpack.c.bf16 %v147_v40, %v147_v40  ;;  %v713_v43 = vpack.c.bf16 %v356_v37, %v356_v37 }
  0xde   :  { %566 = vrot.lane.b32.xlu0 %v714_v36, %s830_s1  ;;  %501 = vst.msk [vmem:[%s1132_s3 + $0x4] sm:$0xf] %vm499_vm1, %v698_v39 }
  0xdf   :  { %v802_v42 = vpop.f32.mrb[2].mxu1  ;;  %500 = vst.msk [vmem:[%s1132_s3] sm:$0xf] %vm499_vm1, %v697_v41  ;;  %v774_v46 = vpop.f32.mrb[2].mxu0 }
  0xe0   :  { %v716_v44 = vpack.c.bf16 %v802_v42, %v802_v42  ;;  %v366_v45 = vpop.f32.mrb[3].mxu1  ;;  %v700_v47 = vpack.c.bf16 %v774_v46, %v774_v46  ;;  %v157_v48 = vpop.f32.mrb[3].mxu0 }
  0xe1   :  { %v699_v49 = vpack.c.bf16 %v157_v48, %v157_v48  ;;  %v715_v51 = vpack.c.bf16 %v366_v45, %v366_v45 }
  0xe2   :  { %564 = vrot.lane.b32.xlu0 %v713_v43, %s830_s1  ;;  %570 = vrot.lane.b32.xlu1 %v716_v44, %s830_s1  ;;  %503 = vst.msk [vmem:[%s1132_s3 + $0xc] sm:$0xf] %vm499_vm1, %v700_v47 }
  0xe3   :  { %v805_v50 = vpop.f32.mrb[4].mxu1  ;;  %502 = vst.msk [vmem:[%s1132_s3 + $0x8] sm:$0xf] %vm499_vm1, %v699_v49  ;;  %v777_v53 = vpop.f32.mrb[4].mxu0 }
  0xe4   :  { %v376_v52 = vpop.f32.mrb[5].mxu1  ;;  %v702_v55 = vpack.c.bf16 %v777_v53, %v777_v53  ;;  %v167_v56 = vpop.f32.mrb[5].mxu0  ;;  %v718_v57 = vpack.c.bf16 %v805_v50, %v805_v50 }
  0xe5   :  { %v717_v54 = vpack.c.bf16 %v376_v52, %v376_v52  ;;  %v701_v58 = vpack.c.bf16 %v167_v56, %v167_v56 }
  0xe6   :  { %568 = vrot.lane.b32.xlu1 %v715_v51, %s830_s1  ;;  %505 = vst.msk [vmem:[%s1132_s3 + $0x14] sm:$0xf] %vm499_vm1, %v702_v55 }
  0xe7   :  { %572 = vrot.lane.b32.xlu0 %v717_v54, %s830_s1  ;;  %v808_v59 = vpop.f32.mrb[6].mxu1  ;;  %504 = vst.msk [vmem:[%s1132_s3 + $0x10] sm:$0xf] %vm499_vm1, %v701_v58  ;;  %v780_v61 = vpop.f32.mrb[6].mxu0 }
  0xe8   :  { %v386_v60 = vpop.f32.mrb[7].mxu1  ;;  %v704_v63 = vpack.c.bf16 %v780_v61, %v780_v61  ;;  %v177_v0 = vpop.f32.mrb[7].mxu0  ;;  %v720_v1 = vpack.c.bf16 %v808_v59, %v808_v59 }
  0xe9   :  { %v719_v62 = vpack.c.bf16 %v386_v60, %v386_v60  ;;  %v703_v2 = vpack.c.bf16 %v177_v0, %v177_v0 }
  0xea   :  { %574 = vrot.lane.b32.xlu1 %v718_v57, %s830_s1  ;;  %507 = vst.msk [vmem:[%s1132_s3 + $0x1c] sm:$0xf] %vm499_vm1, %v704_v63 }
  0xeb   :  { %576 = vrot.lane.b32.xlu0 %v719_v62, %s830_s1  ;;  %v811_v3 = vpop.f32.mrb[8].mxu1  ;;  %506 = vst.msk [vmem:[%s1132_s3 + $0x18] sm:$0xf] %vm499_vm1, %v703_v2  ;;  %v783_v5 = vpop.f32.mrb[8].mxu0 }
  0xec   :  { %v396_v4 = vpop.f32.mrb[9].mxu1  ;;  %v706_v7 = vpack.c.bf16 %v783_v5, %v783_v5  ;;  %v187_v8 = vpop.f32.mrb[9].mxu0  ;;  %v722_v9 = vpack.c.bf16 %v811_v3, %v811_v3 }
  0xed   :  { %v721_v6 = vpack.c.bf16 %v396_v4, %v396_v4  ;;  %v705_v10 = vpack.c.bf16 %v187_v8, %v187_v8 }
  0xee   :  { %578 = vrot.lane.b32.xlu1 %v720_v1, %s830_s1  ;;  %509 = vst.msk [vmem:[%s1132_s3 + $0x24] sm:$0xf] %vm499_vm1, %v706_v7 }
  0xef   :  { %580 = vrot.lane.b32.xlu0 %v721_v6, %s830_s1  ;;  %v814_v11 = vpop.f32.mrb[10].mxu1  ;;  %508 = vst.msk [vmem:[%s1132_s3 + $0x20] sm:$0xf] %vm499_vm1, %v705_v10  ;;  %v786_v13 = vpop.f32.mrb[10].mxu0 }
  0xf0   :  { %v406_v12 = vpop.f32.mrb[11].mxu1  ;;  %v708_v15 = vpack.c.bf16 %v786_v13, %v786_v13  ;;  %v197_v16 = vpop.f32.mrb[11].mxu0  ;;  %v724_v17 = vpack.c.bf16 %v814_v11, %v814_v11 }
  0xf1   :  { %v723_v14 = vpack.c.bf16 %v406_v12, %v406_v12  ;;  %v707_v18 = vpack.c.bf16 %v197_v16, %v197_v16 }
  0xf2   :  { %582 = vrot.lane.b32.xlu1 %v722_v9, %s830_s1  ;;  %511 = vst.msk [vmem:[%s1132_s3 + $0x2c] sm:$0xf] %vm499_vm1, %v708_v15 }
  0xf3   :  { %584 = vrot.lane.b32.xlu0 %v723_v14, %s830_s1  ;;  %v817_v19 = vpop.f32.mrb[12].mxu1  ;;  %510 = vst.msk [vmem:[%s1132_s3 + $0x28] sm:$0xf] %vm499_vm1, %v707_v18  ;;  %v789_v21 = vpop.f32.mrb[12].mxu0 }
  0xf4   :  { %v416_v20 = vpop.f32.mrb[13].mxu1  ;;  %v710_v23 = vpack.c.bf16 %v789_v21, %v789_v21  ;;  %v207_v24 = vpop.f32.mrb[13].mxu0  ;;  %v726_v25 = vpack.c.bf16 %v817_v19, %v817_v19 }
  0xf5   :  { %v725_v22 = vpack.c.bf16 %v416_v20, %v416_v20  ;;  %v709_v26 = vpack.c.bf16 %v207_v24, %v207_v24 }
  0xf6   :  { %586 = vrot.lane.b32.xlu1 %v724_v17, %s830_s1  ;;  %513 = vst.msk [vmem:[%s1132_s3 + $0x34] sm:$0xf] %vm499_vm1, %v710_v23 }
  0xf7   :  { %588 = vrot.lane.b32.xlu0 %v725_v22, %s830_s1  ;;  %v820_v27 = vpop.f32.mrb[14].mxu1  ;;  %512 = vst.msk [vmem:[%s1132_s3 + $0x30] sm:$0xf] %vm499_vm1, %v709_v26  ;;  %v792_v29 = vpop.f32.mrb[14].mxu0 }
  0xf8   :  { %v426_v28 = vpop.f32.mrb[15].mxu1  ;;  %v712_v31 = vpack.c.bf16 %v792_v29, %v792_v29  ;;  %v217_v32 = vpop.f32.mrb[15].mxu0  ;;  %v728_v33 = vpack.c.bf16 %v820_v27, %v820_v27 }
  0xf9   :  { %v727_v30 = vpack.c.bf16 %v426_v28, %v426_v28  ;;  %v711_v34 = vpack.c.bf16 %v217_v32, %v217_v32 }
  0xfa   :  { %590 = vrot.lane.b32.xlu1 %v726_v25, %s830_s1  ;;  %515 = vst.msk [vmem:[%s1132_s3 + $0x3c] sm:$0xf] %vm499_vm1, %v712_v31 }
  0xfb   :  { %592 = vrot.lane.b32.xlu0 %v727_v30, %s830_s1  ;;  %514 = vst.msk [vmem:[%s1132_s3 + $0x38] sm:$0xf] %vm499_vm1, %v711_v34 }
  0xfe   :  { %594 = vrot.lane.b32.xlu1 %v728_v33, %s830_s1 }
 0x150   :  { %v567_v35 = vpop.permute.xlu0 %566 }
 0x151   :  { %614 = vst.msk [vmem:[%s1132_s3 + $0x4] sm:$0xf] %vm612_vm2, %v567_v35 }
 0x154   :  { %v565_v36 = vpop.permute.xlu0 %564  ;;  %v571_v37 = vpop.permute.xlu1 %570 }
 0x155   :  { %613 = vst.msk [vmem:[%s1132_s3] sm:$0xf] %vm612_vm2, %v565_v36  ;;  %616 = vst.msk [vmem:[%s1132_s3 + $0xc] sm:$0xf] %vm612_vm2, %v571_v37 }
 0x158   :  { %v569_v38 = vpop.permute.xlu1 %568 }
 0x159   :  { %615 = vst.msk [vmem:[%s1132_s3 + $0x8] sm:$0xf] %vm612_vm2, %v569_v38  ;;  %v573_v39 = vpop.permute.xlu0 %572 }
 0x15a   :  { %617 = vst.msk [vmem:[%s1132_s3 + $0x10] sm:$0xf] %vm612_vm2, %v573_v39 }
 0x15c   :  { %v575_v40 = vpop.permute.xlu1 %574 }
 0x15d   :  { %618 = vst.msk [vmem:[%s1132_s3 + $0x14] sm:$0xf] %vm612_vm2, %v575_v40  ;;  %v577_v41 = vpop.permute.xlu0 %576 }
 0x15e   :  { %619 = vst.msk [vmem:[%s1132_s3 + $0x18] sm:$0xf] %vm612_vm2, %v577_v41 }
 0x160   :  { %v579_v42 = vpop.permute.xlu1 %578 }
 0x161   :  { %620 = vst.msk [vmem:[%s1132_s3 + $0x1c] sm:$0xf] %vm612_vm2, %v579_v42  ;;  %v581_v43 = vpop.permute.xlu0 %580 }
 0x162   :  { %621 = vst.msk [vmem:[%s1132_s3 + $0x20] sm:$0xf] %vm612_vm2, %v581_v43 }
 0x164   :  { %v583_v44 = vpop.permute.xlu1 %582 }
 0x165   :  { %622 = vst.msk [vmem:[%s1132_s3 + $0x24] sm:$0xf] %vm612_vm2, %v583_v44  ;;  %v585_v45 = vpop.permute.xlu0 %584 }
 0x166   :  { %623 = vst.msk [vmem:[%s1132_s3 + $0x28] sm:$0xf] %vm612_vm2, %v585_v45 }
 0x168   :  { %v587_v46 = vpop.permute.xlu1 %586 }
 0x169   :  { %624 = vst.msk [vmem:[%s1132_s3 + $0x2c] sm:$0xf] %vm612_vm2, %v587_v46  ;;  %v589_v47 = vpop.permute.xlu0 %588 }
 0x16a   :  { %625 = vst.msk [vmem:[%s1132_s3 + $0x30] sm:$0xf] %vm612_vm2, %v589_v47 }
 0x16c   :  { %v591_v48 = vpop.permute.xlu1 %590 }
 0x16d   :  { %626 = vst.msk [vmem:[%s1132_s3 + $0x34] sm:$0xf] %vm612_vm2, %v591_v48  ;;  %v593_v49 = vpop.permute.xlu0 %592 }
 0x16e   :  { %627 = vst.msk [vmem:[%s1132_s3 + $0x38] sm:$0xf] %vm612_vm2, %v593_v49 }
 0x170   :  { %v595_v50 = vpop.permute.xlu1 %594 }
 0x171   :  { %628 = vst.msk [vmem:[%s1132_s3 + $0x3c] sm:$0xf] %vm612_vm2, %v595_v50 }

</bundles_post_ra>
